<compile_context>
chip_gen: v7x
topology: tpu7x:2x2x1
jax: 0.10.0
libtpu: 0.0.40
codegen_flags: <defaults>
</compile_context>

<pallas_src>
import functools

import jax
import jax.numpy as jnp
from jax import lax
from jax.experimental import pallas as pl
from jax.experimental.pallas import tpu as pltpu


def _conv_g_block_kernel(x_ref, w1_ref, b1_ref, w2_ref, b2_ref, mask_ref,
                         o_ref, hpad_ref, *, wp):
    """One batch element per grid step.

    x_ref:    (C_in,  Lin)  flattened zero-padded (Hp x Wp) input, +1 guard elem each side
    w1_ref:   (9, C_out, C_in)   scale-folded conv1 weights, tap-major (dy*3+dx)
    b1_ref:   (C_out, 1)
    w2_ref:   (9, C_out, C_out)  scale-folded conv2 weights
    b2_ref:   (C_out, 1)
    mask_ref: (1, S)   zeroes the width-padding columns of the Wp-strided working layout
    o_ref:    (C_out, S)   output in the Wp-strided working layout (S = H * Wp)
    hpad_ref: (C_out, Lin) VMEM scratch: zero-padded conv2 input
    """
    c_out, s = o_ref.shape

    def conv3x3(src_ref, w_ref, b_ref):
        acc = jnp.zeros((c_out, s), jnp.float32)
        for dy in range(3):
            for dx in range(3):
                start = dy * wp + dx
                tap = src_ref[:, start:start + s]                 # (C_src, S) lane slice
                acc = acc + jnp.dot(w_ref[dy * 3 + dx], tap,
                                    preferred_element_type=jnp.float32)
        return acc + b_ref[...]

    def lrelu_pixelnorm(v):
        v = jnp.maximum(v, 0.2 * v)                               # LeakyReLU(0.2)
        inv = lax.rsqrt(jnp.mean(v * v, axis=0, keepdims=True) + 1e-8)
        return v * inv                                            # PixelNorm over channels

    # ---- conv1 -> LeakyReLU -> PixelNorm ----
    h = lrelu_pixelnorm(conv3x3(x_ref, w1_ref, b1_ref))

    # ---- re-pad for conv2: kill width-padding columns, embed into zeroed scratch ----
    h = h * mask_ref[...]
    hpad_ref[...] = jnp.zeros_like(hpad_ref)
    hpad_ref[:, wp + 1: wp + 1 + s] = h

    # ---- conv2 -> LeakyReLU -> PixelNorm ----
    h2 = lrelu_pixelnorm(conv3x3(hpad_ref, w2_ref, b2_ref))
    o_ref[...] = h2.astype(o_ref.dtype)


def conv_g_block(x, w1, b1, w2, b2, *, gain=2.0):
    """ConvGBlock forward (non-initial path).

    x:  (N, C_in, H0, W0) float32
    w1: (C_out, C_in, 3, 3), b1: (C_out,)
    w2: (C_out, C_out, 3, 3), b2: (C_out,)
    returns (N, C_out, 2*H0, 2*W0)
    """
    n, c_in, h0, w0 = x.shape
    c_out = w1.shape[0]
    h, w = 2 * h0, 2 * w0                    # after nearest 2x upsample
    hp, wp = h + 2, w + 2                    # spatial zero-padding of 1 each side
    s = h * wp                               # width-padded flattened working length
    lin = hp * wp + 2                        # +1 guard element on each end

    scale1 = float((gain / (c_in * 9)) ** 0.5)
    scale2 = float((gain / (c_out * 9)) ** 0.5)

    # Wrapper-side prep (cheap, fused by XLA; no NCHW<->NHWC transposes):
    # nearest 2x upsample -> zero-pad spatially -> flatten -> 1-element guard pad.
    x_up = jnp.repeat(jnp.repeat(x, 2, axis=2), 2, axis=3)
    x_pad = jnp.pad(x_up, ((0, 0), (0, 0), (1, 1), (1, 1)))
    x_in = jnp.pad(x_pad.reshape(n, c_in, hp * wp), ((0, 0), (0, 0), (1, 1)))

    # Fold the equalized-LR scale into the weights; lay out tap-major: (9, C_out, C_src).
    w1_t = jnp.transpose(w1 * scale1, (2, 3, 0, 1)).reshape(9, c_out, c_in)
    w2_t = jnp.transpose(w2 * scale2, (2, 3, 0, 1)).reshape(9, c_out, c_out)
    b1_c = b1.reshape(c_out, 1).astype(jnp.float32)
    b2_c = b2.reshape(c_out, 1).astype(jnp.float32)

    # Mask for the width-padding columns (u == 0 or u == Wp-1) of the working layout.
    col = jnp.arange(s, dtype=jnp.int32) % wp
    mask = ((col != 0) & (col != wp - 1)).astype(jnp.float32).reshape(1, s)

    kernel = functools.partial(_conv_g_block_kernel, wp=wp)

    out_flat = pl.pallas_call(
        kernel,
        out_shape=jax.ShapeDtypeStruct((n, c_out, s), x.dtype),
        grid_spec=pltpu.PrefetchScalarGridSpec(
            num_scalar_prefetch=0,
            grid=(n,),
            in_specs=[
                pl.BlockSpec((None, c_in, lin), lambda i: (i, 0, 0)),   # x (per batch)
                pl.BlockSpec((9, c_out, c_in), lambda i: (0, 0, 0)),    # w1 (invariant)
                pl.BlockSpec((c_out, 1), lambda i: (0, 0)),             # b1
                pl.BlockSpec((9, c_out, c_out), lambda i: (0, 0, 0)),   # w2
                pl.BlockSpec((c_out, 1), lambda i: (0, 0)),             # b2
                pl.BlockSpec((1, s), lambda i: (0, 0)),                 # column mask
            ],
            out_specs=pl.BlockSpec((None, c_out, s), lambda i: (i, 0, 0)),
            scratch_shapes=[pltpu.VMEM((c_out, lin), jnp.float32)],
        ),
        compiler_params=pltpu.CompilerParams(
            dimension_semantics=("parallel",)),
    )(x_in, w1_t, b1_c, w2_t, b2_c, mask)

    # (N, C_out, H*Wp) -> (N, C_out, H, Wp) -> drop the width-padding columns -> NCHW.
    return out_flat.reshape(n, c_out, h, wp)[:, :, :, 1:w + 1]


def conv_g_block_reference(x, w1, b1, w2, b2, *, gain=2.0):
    """Pure-JAX reference matching the PyTorch ConvGBlock (non-initial path)."""
    c_in = x.shape[1]
    c_out = w1.shape[0]
    scale1 = (gain / (c_in * 9)) ** 0.5
    scale2 = (gain / (c_out * 9)) ** 0.5
    x = jnp.repeat(jnp.repeat(x, 2, axis=2), 2, axis=3)   # nearest 2x upsample

    def wsconv(v, wt, b, scale):
        y = lax.conv_general_dilated(
            v * scale, wt, window_strides=(1, 1), padding=((1, 1), (1, 1)),
            dimension_numbers=("NCHW", "OIHW", "NCHW"),
            precision=lax.Precision.HIGHEST)
        return y + b.reshape(1, -1, 1, 1)

    def act(v):
        v = jnp.maximum(v, 0.2 * v)                        # LeakyReLU(0.2)
        return v * lax.rsqrt(jnp.mean(v * v, axis=1, keepdims=True) + 1e-8)

    hmid = act(wsconv(x, w1, b1, scale1))
    return act(wsconv(hmid, w2, b2, scale2))


if __name__ == "__main__":
    key = jax.random.PRNGKey(0)
    k_x, k_w1, k_w2 = jax.random.split(key, 3)

    # Small shapes consistent with the module: batch=2, in_channels=4, out_channels=8,
    # spatial 16x16 (-> 32x32 after the block's nearest 2x upsample).
    N, C_IN, C_OUT, H0, W0 = 2, 4, 8, 16, 16

    x = jax.random.normal(k_x, (N, C_IN, H0, W0), dtype=jnp.float32)
    # WSConv2d init per the module: weight ~ N(0,1), bias = 0.
    w1 = jax.random.normal(k_w1, (C_OUT, C_IN, 3, 3), dtype=jnp.float32)
    w2 = jax.random.normal(k_w2, (C_OUT, C_OUT, 3, 3), dtype=jnp.float32)
    b1 = jnp.zeros((C_OUT,), dtype=jnp.float32)
    b2 = jnp.zeros((C_OUT,), dtype=jnp.float32)

    y = conv_g_block(x, w1, b1, w2, b2)
    y = jax.block_until_ready(y)

    y_ref = conv_g_block_reference(x, w1, b1, w2, b2)
    assert y.shape == (N, C_OUT, 2 * H0, 2 * W0)
    assert jnp.allclose(y, y_ref, atol=1e-3, rtol=1e-3), "mismatch vs reference"

    print("KERNEL_OK")
</pallas_src>

<mosaic_0001>
module attributes {stable_mosaic.version = 11 : i64} {
  func.func @_conv_g_block_kernel(%arg0: i32, %arg1: memref<1x4x1158xf32, #tpu.memory_space<vmem>>, %arg2: memref<9x8x4xf32, #tpu.memory_space<vmem>>, %arg3: memref<8x1xf32, #tpu.memory_space<vmem>>, %arg4: memref<9x8x8xf32, #tpu.memory_space<vmem>>, %arg5: memref<8x1xf32, #tpu.memory_space<vmem>>, %arg6: memref<1x1088xf32, #tpu.memory_space<vmem>>, %arg7: memref<1x8x1088xf32, #tpu.memory_space<vmem>>, %arg8: memref<8x1158xf32, #tpu.memory_space<vmem>>) attributes {dimension_semantics = [#tpu.dimension_semantics<parallel>], iteration_bounds = array<i64: 2>, scalar_prefetch = 0 : i64, scratch_operands = 1 : i64, tpu.core_type = #tpu.core_type<tc>, window_params = [{transform_indices = @transform_0, window_bounds = array<i64: 1, 4, 1158>}, {pipeline_mode = #tpu.pipeline_mode<synchronous>, transform_indices = @transform_1, window_bounds = array<i64: 9, 8, 4>}, {pipeline_mode = #tpu.pipeline_mode<synchronous>, transform_indices = @transform_2, window_bounds = array<i64: 8, 1>}, {pipeline_mode = #tpu.pipeline_mode<synchronous>, transform_indices = @transform_3, window_bounds = array<i64: 9, 8, 8>}, {pipeline_mode = #tpu.pipeline_mode<synchronous>, transform_indices = @transform_4, window_bounds = array<i64: 8, 1>}, {pipeline_mode = #tpu.pipeline_mode<synchronous>, transform_indices = @transform_5, window_bounds = array<i64: 1, 1088>}, {transform_indices = @transform_6, window_bounds = array<i64: 1, 8, 1088>}]} {
    %cst = arith.constant 0.000000e+00 : f32
    %0 = vector.broadcast %cst : f32 to vector<8x1088xf32>
    %c0 = arith.constant 0 : index
    %c0_0 = arith.constant 0 : index
    %c0_1 = arith.constant 0 : index
    %1 = vector.load %arg1[%c0, %c0_0, %c0_1] : memref<1x4x1158xf32, #tpu.memory_space<vmem>>, vector<1x4x1088xf32>
    %2 = vector.shape_cast %1 : vector<1x4x1088xf32> to vector<4x1088xf32>
    %c0_2 = arith.constant 0 : index
    %c0_3 = arith.constant 0 : index
    %c0_4 = arith.constant 0 : index
    %3 = vector.load %arg2[%c0_2, %c0_3, %c0_4] : memref<9x8x4xf32, #tpu.memory_space<vmem>>, vector<1x8x4xf32>
    %4 = vector.shape_cast %3 : vector<1x8x4xf32> to vector<8x4xf32>
    %cst_5 = arith.constant dense<0.000000e+00> : vector<8x1088xf32>
    %5 = tpu.matmul %4, %2, %cst_5 {dimension_numbers = #tpu.dot_dimension_numbers<[1], [0], [0], [1], [0, 0, 1, 1], [], []>} : vector<8x4xf32>, vector<4x1088xf32>, vector<8x1088xf32> -> vector<8x1088xf32>
    %6 = arith.addf %0, %5 : vector<8x1088xf32>
    %c0_6 = arith.constant 0 : index
    %c0_7 = arith.constant 0 : index
    %c1 = arith.constant 1 : index
    %7 = vector.load %arg1[%c0_6, %c0_7, %c1] : memref<1x4x1158xf32, #tpu.memory_space<vmem>>, vector<1x4x1088xf32>
    %8 = vector.shape_cast %7 : vector<1x4x1088xf32> to vector<4x1088xf32>
    %c1_8 = arith.constant 1 : index
    %c0_9 = arith.constant 0 : index
    %c0_10 = arith.constant 0 : index
    %9 = vector.load %arg2[%c1_8, %c0_9, %c0_10] : memref<9x8x4xf32, #tpu.memory_space<vmem>>, vector<1x8x4xf32>
    %10 = vector.shape_cast %9 : vector<1x8x4xf32> to vector<8x4xf32>
    %cst_11 = arith.constant dense<0.000000e+00> : vector<8x1088xf32>
    %11 = tpu.matmul %10, %8, %cst_11 {dimension_numbers = #tpu.dot_dimension_numbers<[1], [0], [0], [1], [0, 0, 1, 1], [], []>} : vector<8x4xf32>, vector<4x1088xf32>, vector<8x1088xf32> -> vector<8x1088xf32>
    %12 = arith.addf %6, %11 : vector<8x1088xf32>
    %c0_12 = arith.constant 0 : index
    %c0_13 = arith.constant 0 : index
    %c2 = arith.constant 2 : index
    %13 = vector.load %arg1[%c0_12, %c0_13, %c2] : memref<1x4x1158xf32, #tpu.memory_space<vmem>>, vector<1x4x1088xf32>
    %14 = vector.shape_cast %13 : vector<1x4x1088xf32> to vector<4x1088xf32>
    %c2_14 = arith.constant 2 : index
    %c0_15 = arith.constant 0 : index
    %c0_16 = arith.constant 0 : index
    %15 = vector.load %arg2[%c2_14, %c0_15, %c0_16] : memref<9x8x4xf32, #tpu.memory_space<vmem>>, vector<1x8x4xf32>
    %16 = vector.shape_cast %15 : vector<1x8x4xf32> to vector<8x4xf32>
    %cst_17 = arith.constant dense<0.000000e+00> : vector<8x1088xf32>
    %17 = tpu.matmul %16, %14, %cst_17 {dimension_numbers = #tpu.dot_dimension_numbers<[1], [0], [0], [1], [0, 0, 1, 1], [], []>} : vector<8x4xf32>, vector<4x1088xf32>, vector<8x1088xf32> -> vector<8x1088xf32>
    %18 = arith.addf %12, %17 : vector<8x1088xf32>
    %c0_18 = arith.constant 0 : index
    %c0_19 = arith.constant 0 : index
    %c34 = arith.constant 34 : index
    %19 = vector.load %arg1[%c0_18, %c0_19, %c34] : memref<1x4x1158xf32, #tpu.memory_space<vmem>>, vector<1x4x1088xf32>
    %20 = vector.shape_cast %19 : vector<1x4x1088xf32> to vector<4x1088xf32>
    %c3 = arith.constant 3 : index
    %c0_20 = arith.constant 0 : index
    %c0_21 = arith.constant 0 : index
    %21 = vector.load %arg2[%c3, %c0_20, %c0_21] : memref<9x8x4xf32, #tpu.memory_space<vmem>>, vector<1x8x4xf32>
    %22 = vector.shape_cast %21 : vector<1x8x4xf32> to vector<8x4xf32>
    %cst_22 = arith.constant dense<0.000000e+00> : vector<8x1088xf32>
    %23 = tpu.matmul %22, %20, %cst_22 {dimension_numbers = #tpu.dot_dimension_numbers<[1], [0], [0], [1], [0, 0, 1, 1], [], []>} : vector<8x4xf32>, vector<4x1088xf32>, vector<8x1088xf32> -> vector<8x1088xf32>
    %24 = arith.addf %18, %23 : vector<8x1088xf32>
    %c0_23 = arith.constant 0 : index
    %c0_24 = arith.constant 0 : index
    %c35 = arith.constant 35 : index
    %25 = vector.load %arg1[%c0_23, %c0_24, %c35] : memref<1x4x1158xf32, #tpu.memory_space<vmem>>, vector<1x4x1088xf32>
    %26 = vector.shape_cast %25 : vector<1x4x1088xf32> to vector<4x1088xf32>
    %c4 = arith.constant 4 : index
    %c0_25 = arith.constant 0 : index
    %c0_26 = arith.constant 0 : index
    %27 = vector.load %arg2[%c4, %c0_25, %c0_26] : memref<9x8x4xf32, #tpu.memory_space<vmem>>, vector<1x8x4xf32>
    %28 = vector.shape_cast %27 : vector<1x8x4xf32> to vector<8x4xf32>
    %cst_27 = arith.constant dense<0.000000e+00> : vector<8x1088xf32>
    %29 = tpu.matmul %28, %26, %cst_27 {dimension_numbers = #tpu.dot_dimension_numbers<[1], [0], [0], [1], [0, 0, 1, 1], [], []>} : vector<8x4xf32>, vector<4x1088xf32>, vector<8x1088xf32> -> vector<8x1088xf32>
    %30 = arith.addf %24, %29 : vector<8x1088xf32>
    %c0_28 = arith.constant 0 : index
    %c0_29 = arith.constant 0 : index
    %c36 = arith.constant 36 : index
    %31 = vector.load %arg1[%c0_28, %c0_29, %c36] : memref<1x4x1158xf32, #tpu.memory_space<vmem>>, vector<1x4x1088xf32>
    %32 = vector.shape_cast %31 : vector<1x4x1088xf32> to vector<4x1088xf32>
    %c5 = arith.constant 5 : index
    %c0_30 = arith.constant 0 : index
    %c0_31 = arith.constant 0 : index
    %33 = vector.load %arg2[%c5, %c0_30, %c0_31] : memref<9x8x4xf32, #tpu.memory_space<vmem>>, vector<1x8x4xf32>
    %34 = vector.shape_cast %33 : vector<1x8x4xf32> to vector<8x4xf32>
    %cst_32 = arith.constant dense<0.000000e+00> : vector<8x1088xf32>
    %35 = tpu.matmul %34, %32, %cst_32 {dimension_numbers = #tpu.dot_dimension_numbers<[1], [0], [0], [1], [0, 0, 1, 1], [], []>} : vector<8x4xf32>, vector<4x1088xf32>, vector<8x1088xf32> -> vector<8x1088xf32>
    %36 = arith.addf %30, %35 : vector<8x1088xf32>
    %c0_33 = arith.constant 0 : index
    %c0_34 = arith.constant 0 : index
    %c68 = arith.constant 68 : index
    %37 = vector.load %arg1[%c0_33, %c0_34, %c68] : memref<1x4x1158xf32, #tpu.memory_space<vmem>>, vector<1x4x1088xf32>
    %38 = vector.shape_cast %37 : vector<1x4x1088xf32> to vector<4x1088xf32>
    %c6 = arith.constant 6 : index
    %c0_35 = arith.constant 0 : index
    %c0_36 = arith.constant 0 : index
    %39 = vector.load %arg2[%c6, %c0_35, %c0_36] : memref<9x8x4xf32, #tpu.memory_space<vmem>>, vector<1x8x4xf32>
    %40 = vector.shape_cast %39 : vector<1x8x4xf32> to vector<8x4xf32>
    %cst_37 = arith.constant dense<0.000000e+00> : vector<8x1088xf32>
    %41 = tpu.matmul %40, %38, %cst_37 {dimension_numbers = #tpu.dot_dimension_numbers<[1], [0], [0], [1], [0, 0, 1, 1], [], []>} : vector<8x4xf32>, vector<4x1088xf32>, vector<8x1088xf32> -> vector<8x1088xf32>
    %42 = arith.addf %36, %41 : vector<8x1088xf32>
    %c0_38 = arith.constant 0 : index
    %c0_39 = arith.constant 0 : index
    %c69 = arith.constant 69 : index
    %43 = vector.load %arg1[%c0_38, %c0_39, %c69] : memref<1x4x1158xf32, #tpu.memory_space<vmem>>, vector<1x4x1088xf32>
    %44 = vector.shape_cast %43 : vector<1x4x1088xf32> to vector<4x1088xf32>
    %c7 = arith.constant 7 : index
    %c0_40 = arith.constant 0 : index
    %c0_41 = arith.constant 0 : index
    %45 = vector.load %arg2[%c7, %c0_40, %c0_41] : memref<9x8x4xf32, #tpu.memory_space<vmem>>, vector<1x8x4xf32>
    %46 = vector.shape_cast %45 : vector<1x8x4xf32> to vector<8x4xf32>
    %cst_42 = arith.constant dense<0.000000e+00> : vector<8x1088xf32>
    %47 = tpu.matmul %46, %44, %cst_42 {dimension_numbers = #tpu.dot_dimension_numbers<[1], [0], [0], [1], [0, 0, 1, 1], [], []>} : vector<8x4xf32>, vector<4x1088xf32>, vector<8x1088xf32> -> vector<8x1088xf32>
    %48 = arith.addf %42, %47 : vector<8x1088xf32>
    %c0_43 = arith.constant 0 : index
    %c0_44 = arith.constant 0 : index
    %c70 = arith.constant 70 : index
    %49 = vector.load %arg1[%c0_43, %c0_44, %c70] : memref<1x4x1158xf32, #tpu.memory_space<vmem>>, vector<1x4x1088xf32>
    %50 = vector.shape_cast %49 : vector<1x4x1088xf32> to vector<4x1088xf32>
    %c8 = arith.constant 8 : index
    %c0_45 = arith.constant 0 : index
    %c0_46 = arith.constant 0 : index
    %51 = vector.load %arg2[%c8, %c0_45, %c0_46] : memref<9x8x4xf32, #tpu.memory_space<vmem>>, vector<1x8x4xf32>
    %52 = vector.shape_cast %51 : vector<1x8x4xf32> to vector<8x4xf32>
    %cst_47 = arith.constant dense<0.000000e+00> : vector<8x1088xf32>
    %53 = tpu.matmul %52, %50, %cst_47 {dimension_numbers = #tpu.dot_dimension_numbers<[1], [0], [0], [1], [0, 0, 1, 1], [], []>} : vector<8x4xf32>, vector<4x1088xf32>, vector<8x1088xf32> -> vector<8x1088xf32>
    %54 = arith.addf %48, %53 : vector<8x1088xf32>
    %c0_48 = arith.constant 0 : index
    %c0_49 = arith.constant 0 : index
    %55 = vector.load %arg3[%c0_48, %c0_49] : memref<8x1xf32, #tpu.memory_space<vmem>>, vector<8x1xf32>
    %56 = vector.broadcast %55 : vector<8x1xf32> to vector<8x1088xf32>
    %57 = arith.addf %54, %56 : vector<8x1088xf32>
    %cst_50 = arith.constant 2.000000e-01 : f32
    %58 = vector.broadcast %cst_50 : f32 to vector<8x1088xf32>
    %59 = arith.mulf %58, %57 : vector<8x1088xf32>
    %60 = arith.maximumf %57, %59 : vector<8x1088xf32>
    %61 = arith.mulf %60, %60 : vector<8x1088xf32>
    %cst_51 = arith.constant dense<0.000000e+00> : vector<1088xf32>
    %62 = vector.multi_reduction <add>, %61, %cst_51 [0] : vector<8x1088xf32> to vector<1088xf32>
    %63 = vector.shape_cast %62 : vector<1088xf32> to vector<1x1088xf32>
    %cst_52 = arith.constant 8.000000e+00 : f32
    %64 = vector.broadcast %cst_52 : f32 to vector<1x1088xf32>
    %65 = arith.divf %63, %64 : vector<1x1088xf32>
    %cst_53 = arith.constant 9.99999993E-9 : f32
    %66 = vector.broadcast %cst_53 : f32 to vector<1x1088xf32>
    %67 = arith.addf %65, %66 : vector<1x1088xf32>
    %68 = math.rsqrt %67 : vector<1x1088xf32>
    %69 = vector.broadcast %68 : vector<1x1088xf32> to vector<8x1088xf32>
    %70 = arith.mulf %60, %69 : vector<8x1088xf32>
    %c0_54 = arith.constant 0 : index
    %c0_55 = arith.constant 0 : index
    %71 = vector.load %arg6[%c0_54, %c0_55] : memref<1x1088xf32, #tpu.memory_space<vmem>>, vector<1x1088xf32>
    %72 = vector.broadcast %71 : vector<1x1088xf32> to vector<8x1088xf32>
    %73 = arith.mulf %70, %72 : vector<8x1088xf32>
    %cst_56 = arith.constant 0.000000e+00 : f32
    %74 = vector.broadcast %cst_56 : f32 to vector<8x1158xf32>
    %c0_57 = arith.constant 0 : index
    %c0_58 = arith.constant 0 : index
    %75 = vector.load %arg8[%c0_57, %c0_58] : memref<8x1158xf32, #tpu.memory_space<vmem>>, vector<8x1158xf32>
    tpu.vector_store %arg8[%c0_57, %c0_58], %74 {strides = array<i32>} : memref<8x1158xf32, #tpu.memory_space<vmem>>, vector<8x1158xf32>,
    %c0_59 = arith.constant 0 : index
    %c35_60 = arith.constant 35 : index
    %76 = vector.load %arg8[%c0_59, %c35_60] : memref<8x1158xf32, #tpu.memory_space<vmem>>, vector<8x1088xf32>
    tpu.vector_store %arg8[%c0_59, %c35_60], %73 {strides = array<i32>} : memref<8x1158xf32, #tpu.memory_space<vmem>>, vector<8x1088xf32>,
    %cst_61 = arith.constant 0.000000e+00 : f32
    %77 = vector.broadcast %cst_61 : f32 to vector<8x1088xf32>
    %c0_62 = arith.constant 0 : index
    %c0_63 = arith.constant 0 : index
    %78 = vector.load %arg8[%c0_62, %c0_63] : memref<8x1158xf32, #tpu.memory_space<vmem>>, vector<8x1088xf32>
    %c0_64 = arith.constant 0 : index
    %c0_65 = arith.constant 0 : index
    %c0_66 = arith.constant 0 : index
    %79 = vector.load %arg4[%c0_64, %c0_65, %c0_66] : memref<9x8x8xf32, #tpu.memory_space<vmem>>, vector<1x8x8xf32>
    %80 = vector.shape_cast %79 : vector<1x8x8xf32> to vector<8x8xf32>
    %cst_67 = arith.constant dense<0.000000e+00> : vector<8x1088xf32>
    %81 = tpu.matmul %80, %78, %cst_67 {dimension_numbers = #tpu.dot_dimension_numbers<[1], [0], [0], [1], [0, 0, 1, 1], [], []>} : vector<8x8xf32>, vector<8x1088xf32>, vector<8x1088xf32> -> vector<8x1088xf32>
    %82 = arith.addf %77, %81 : vector<8x1088xf32>
    %c0_68 = arith.constant 0 : index
    %c1_69 = arith.constant 1 : index
    %83 = vector.load %arg8[%c0_68, %c1_69] : memref<8x1158xf32, #tpu.memory_space<vmem>>, vector<8x1088xf32>
    %c1_70 = arith.constant 1 : index
    %c0_71 = arith.constant 0 : index
    %c0_72 = arith.constant 0 : index
    %84 = vector.load %arg4[%c1_70, %c0_71, %c0_72] : memref<9x8x8xf32, #tpu.memory_space<vmem>>, vector<1x8x8xf32>
    %85 = vector.shape_cast %84 : vector<1x8x8xf32> to vector<8x8xf32>
    %cst_73 = arith.constant dense<0.000000e+00> : vector<8x1088xf32>
    %86 = tpu.matmul %85, %83, %cst_73 {dimension_numbers = #tpu.dot_dimension_numbers<[1], [0], [0], [1], [0, 0, 1, 1], [], []>} : vector<8x8xf32>, vector<8x1088xf32>, vector<8x1088xf32> -> vector<8x1088xf32>
    %87 = arith.addf %82, %86 : vector<8x1088xf32>
    %c0_74 = arith.constant 0 : index
    %c2_75 = arith.constant 2 : index
    %88 = vector.load %arg8[%c0_74, %c2_75] : memref<8x1158xf32, #tpu.memory_space<vmem>>, vector<8x1088xf32>
    %c2_76 = arith.constant 2 : index
    %c0_77 = arith.constant 0 : index
    %c0_78 = arith.constant 0 : index
    %89 = vector.load %arg4[%c2_76, %c0_77, %c0_78] : memref<9x8x8xf32, #tpu.memory_space<vmem>>, vector<1x8x8xf32>
    %90 = vector.shape_cast %89 : vector<1x8x8xf32> to vector<8x8xf32>
    %cst_79 = arith.constant dense<0.000000e+00> : vector<8x1088xf32>
    %91 = tpu.matmul %90, %88, %cst_79 {dimension_numbers = #tpu.dot_dimension_numbers<[1], [0], [0], [1], [0, 0, 1, 1], [], []>} : vector<8x8xf32>, vector<8x1088xf32>, vector<8x1088xf32> -> vector<8x1088xf32>
    %92 = arith.addf %87, %91 : vector<8x1088xf32>
    %c0_80 = arith.constant 0 : index
    %c34_81 = arith.constant 34 : index
    %93 = vector.load %arg8[%c0_80, %c34_81] : memref<8x1158xf32, #tpu.memory_space<vmem>>, vector<8x1088xf32>
    %c3_82 = arith.constant 3 : index
    %c0_83 = arith.constant 0 : index
    %c0_84 = arith.constant 0 : index
    %94 = vector.load %arg4[%c3_82, %c0_83, %c0_84] : memref<9x8x8xf32, #tpu.memory_space<vmem>>, vector<1x8x8xf32>
    %95 = vector.shape_cast %94 : vector<1x8x8xf32> to vector<8x8xf32>
    %cst_85 = arith.constant dense<0.000000e+00> : vector<8x1088xf32>
    %96 = tpu.matmul %95, %93, %cst_85 {dimension_numbers = #tpu.dot_dimension_numbers<[1], [0], [0], [1], [0, 0, 1, 1], [], []>} : vector<8x8xf32>, vector<8x1088xf32>, vector<8x1088xf32> -> vector<8x1088xf32>
    %97 = arith.addf %92, %96 : vector<8x1088xf32>
    %c0_86 = arith.constant 0 : index
    %c35_87 = arith.constant 35 : index
    %98 = vector.load %arg8[%c0_86, %c35_87] : memref<8x1158xf32, #tpu.memory_space<vmem>>, vector<8x1088xf32>
    %c4_88 = arith.constant 4 : index
    %c0_89 = arith.constant 0 : index
    %c0_90 = arith.constant 0 : index
    %99 = vector.load %arg4[%c4_88, %c0_89, %c0_90] : memref<9x8x8xf32, #tpu.memory_space<vmem>>, vector<1x8x8xf32>
    %100 = vector.shape_cast %99 : vector<1x8x8xf32> to vector<8x8xf32>
    %cst_91 = arith.constant dense<0.000000e+00> : vector<8x1088xf32>
    %101 = tpu.matmul %100, %98, %cst_91 {dimension_numbers = #tpu.dot_dimension_numbers<[1], [0], [0], [1], [0, 0, 1, 1], [], []>} : vector<8x8xf32>, vector<8x1088xf32>, vector<8x1088xf32> -> vector<8x1088xf32>
    %102 = arith.addf %97, %101 : vector<8x1088xf32>
    %c0_92 = arith.constant 0 : index
    %c36_93 = arith.constant 36 : index
    %103 = vector.load %arg8[%c0_92, %c36_93] : memref<8x1158xf32, #tpu.memory_space<vmem>>, vector<8x1088xf32>
    %c5_94 = arith.constant 5 : index
    %c0_95 = arith.constant 0 : index
    %c0_96 = arith.constant 0 : index
    %104 = vector.load %arg4[%c5_94, %c0_95, %c0_96] : memref<9x8x8xf32, #tpu.memory_space<vmem>>, vector<1x8x8xf32>
    %105 = vector.shape_cast %104 : vector<1x8x8xf32> to vector<8x8xf32>
    %cst_97 = arith.constant dense<0.000000e+00> : vector<8x1088xf32>
    %106 = tpu.matmul %105, %103, %cst_97 {dimension_numbers = #tpu.dot_dimension_numbers<[1], [0], [0], [1], [0, 0, 1, 1], [], []>} : vector<8x8xf32>, vector<8x1088xf32>, vector<8x1088xf32> -> vector<8x1088xf32>
    %107 = arith.addf %102, %106 : vector<8x1088xf32>
    %c0_98 = arith.constant 0 : index
    %c68_99 = arith.constant 68 : index
    %108 = vector.load %arg8[%c0_98, %c68_99] : memref<8x1158xf32, #tpu.memory_space<vmem>>, vector<8x1088xf32>
    %c6_100 = arith.constant 6 : index
    %c0_101 = arith.constant 0 : index
    %c0_102 = arith.constant 0 : index
    %109 = vector.load %arg4[%c6_100, %c0_101, %c0_102] : memref<9x8x8xf32, #tpu.memory_space<vmem>>, vector<1x8x8xf32>
    %110 = vector.shape_cast %109 : vector<1x8x8xf32> to vector<8x8xf32>
    %cst_103 = arith.constant dense<0.000000e+00> : vector<8x1088xf32>
    %111 = tpu.matmul %110, %108, %cst_103 {dimension_numbers = #tpu.dot_dimension_numbers<[1], [0], [0], [1], [0, 0, 1, 1], [], []>} : vector<8x8xf32>, vector<8x1088xf32>, vector<8x1088xf32> -> vector<8x1088xf32>
    %112 = arith.addf %107, %111 : vector<8x1088xf32>
    %c0_104 = arith.constant 0 : index
    %c69_105 = arith.constant 69 : index
    %113 = vector.load %arg8[%c0_104, %c69_105] : memref<8x1158xf32, #tpu.memory_space<vmem>>, vector<8x1088xf32>
    %c7_106 = arith.constant 7 : index
    %c0_107 = arith.constant 0 : index
    %c0_108 = arith.constant 0 : index
    %114 = vector.load %arg4[%c7_106, %c0_107, %c0_108] : memref<9x8x8xf32, #tpu.memory_space<vmem>>, vector<1x8x8xf32>
    %115 = vector.shape_cast %114 : vector<1x8x8xf32> to vector<8x8xf32>
    %cst_109 = arith.constant dense<0.000000e+00> : vector<8x1088xf32>
    %116 = tpu.matmul %115, %113, %cst_109 {dimension_numbers = #tpu.dot_dimension_numbers<[1], [0], [0], [1], [0, 0, 1, 1], [], []>} : vector<8x8xf32>, vector<8x1088xf32>, vector<8x1088xf32> -> vector<8x1088xf32>
    %117 = arith.addf %112, %116 : vector<8x1088xf32>
    %c0_110 = arith.constant 0 : index
    %c70_111 = arith.constant 70 : index
    %118 = vector.load %arg8[%c0_110, %c70_111] : memref<8x1158xf32, #tpu.memory_space<vmem>>, vector<8x1088xf32>
    %c8_112 = arith.constant 8 : index
    %c0_113 = arith.constant 0 : index
    %c0_114 = arith.constant 0 : index
    %119 = vector.load %arg4[%c8_112, %c0_113, %c0_114] : memref<9x8x8xf32, #tpu.memory_space<vmem>>, vector<1x8x8xf32>
    %120 = vector.shape_cast %119 : vector<1x8x8xf32> to vector<8x8xf32>
    %cst_115 = arith.constant dense<0.000000e+00> : vector<8x1088xf32>
    %121 = tpu.matmul %120, %118, %cst_115 {dimension_numbers = #tpu.dot_dimension_numbers<[1], [0], [0], [1], [0, 0, 1, 1], [], []>} : vector<8x8xf32>, vector<8x1088xf32>, vector<8x1088xf32> -> vector<8x1088xf32>
    %122 = arith.addf %117, %121 : vector<8x1088xf32>
    %c0_116 = arith.constant 0 : index
    %c0_117 = arith.constant 0 : index
    %123 = vector.load %arg5[%c0_116, %c0_117] : memref<8x1xf32, #tpu.memory_space<vmem>>, vector<8x1xf32>
    %124 = vector.broadcast %123 : vector<8x1xf32> to vector<8x1088xf32>
    %125 = arith.addf %122, %124 : vector<8x1088xf32>
    %cst_118 = arith.constant 2.000000e-01 : f32
    %126 = vector.broadcast %cst_118 : f32 to vector<8x1088xf32>
    %127 = arith.mulf %126, %125 : vector<8x1088xf32>
    %128 = arith.maximumf %125, %127 : vector<8x1088xf32>
    %129 = arith.mulf %128, %128 : vector<8x1088xf32>
    %cst_119 = arith.constant dense<0.000000e+00> : vector<1088xf32>
    %130 = vector.multi_reduction <add>, %129, %cst_119 [0] : vector<8x1088xf32> to vector<1088xf32>
    %131 = vector.shape_cast %130 : vector<1088xf32> to vector<1x1088xf32>
    %cst_120 = arith.constant 8.000000e+00 : f32
    %132 = vector.broadcast %cst_120 : f32 to vector<1x1088xf32>
    %133 = arith.divf %131, %132 : vector<1x1088xf32>
    %cst_121 = arith.constant 9.99999993E-9 : f32
    %134 = vector.broadcast %cst_121 : f32 to vector<1x1088xf32>
    %135 = arith.addf %133, %134 : vector<1x1088xf32>
    %136 = math.rsqrt %135 : vector<1x1088xf32>
    %137 = vector.broadcast %136 : vector<1x1088xf32> to vector<8x1088xf32>
    %138 = arith.mulf %128, %137 : vector<8x1088xf32>
    %c0_122 = arith.constant 0 : index
    %c0_123 = arith.constant 0 : index
    %c0_124 = arith.constant 0 : index
    %139 = vector.load %arg7[%c0_122, %c0_123, %c0_124] : memref<1x8x1088xf32, #tpu.memory_space<vmem>>, vector<1x8x1088xf32>
    %140 = vector.shape_cast %139 : vector<1x8x1088xf32> to vector<8x1088xf32>
    %141 = vector.shape_cast %138 : vector<8x1088xf32> to vector<1x8x1088xf32>
    tpu.vector_store %arg7[%c0_122, %c0_123, %c0_124], %141 {strides = array<i32>} : memref<1x8x1088xf32, #tpu.memory_space<vmem>>, vector<1x8x1088xf32>,
    return
  }
  func.func @transform_0(%arg0: i32) -> (i32, i32, i32) {
    %c0_i32 = arith.constant 0 : i32
    %c0_i32_0 = arith.constant 0 : i32
    %c0_i32_1 = arith.constant 0 : i32
    return %arg0, %c0_i32, %c0_i32_0 : i32, i32, i32
  }
  func.func @transform_1(%arg0: i32) -> (i32, i32, i32) {
    %c0_i32 = arith.constant 0 : i32
    %c0_i32_0 = arith.constant 0 : i32
    %c0_i32_1 = arith.constant 0 : i32
    %c0_i32_2 = arith.constant 0 : i32
    return %c0_i32, %c0_i32_0, %c0_i32_1 : i32, i32, i32
  }
  func.func @transform_2(%arg0: i32) -> (i32, i32) {
    %c0_i32 = arith.constant 0 : i32
    %c0_i32_0 = arith.constant 0 : i32
    %c0_i32_1 = arith.constant 0 : i32
    return %c0_i32, %c0_i32_0 : i32, i32
  }
  func.func @transform_3(%arg0: i32) -> (i32, i32, i32) {
    %c0_i32 = arith.constant 0 : i32
    %c0_i32_0 = arith.constant 0 : i32
    %c0_i32_1 = arith.constant 0 : i32
    %c0_i32_2 = arith.constant 0 : i32
    return %c0_i32, %c0_i32_0, %c0_i32_1 : i32, i32, i32
  }
  func.func @transform_4(%arg0: i32) -> (i32, i32) {
    %c0_i32 = arith.constant 0 : i32
    %c0_i32_0 = arith.constant 0 : i32
    %c0_i32_1 = arith.constant 0 : i32
    return %c0_i32, %c0_i32_0 : i32, i32
  }
  func.func @transform_5(%arg0: i32) -> (i32, i32) {
    %c0_i32 = arith.constant 0 : i32
    %c0_i32_0 = arith.constant 0 : i32
    %c0_i32_1 = arith.constant 0 : i32
    return %c0_i32, %c0_i32_0 : i32, i32
  }
  func.func @transform_6(%arg0: i32) -> (i32, i32, i32) {
    %c0_i32 = arith.constant 0 : i32
    %c0_i32_0 = arith.constant 0 : i32
    %c0_i32_1 = arith.constant 0 : i32
    return %arg0, %c0_i32, %c0_i32_0 : i32, i32, i32
  }
}

</mosaic_0001>

<bundles_post_ra>
// kernel: tpu_custom_call.1
= control target key start
LH: loop header
LB: loop body
LE: loop exit
PB: predicated region body
PF: predicated region fallthrough
CT: control target
= control target key end

     0   :  { %11 = vsyncpa [#allocation4], 0  ;;  %s10138_s0 = inlined_call_operand.vmem [shape: f32[2,4,1158], index: 0, kind: input, shape index: {}]   ;;  %s10139_s1 = inlined_call_operand.vmem [shape: f32[9,8,4], index: 1, kind: input, shape index: {}]   ;;  %s10140_s2 = inlined_call_operand.vmem [shape: f32[8,1], index: 2, kind: input, shape index: {}]   ;;  %s10141_s3 = inlined_call_operand.vmem [shape: f32[9,8,8], index: 3, kind: input, shape index: {}]   ;;  %s10142_s4 = inlined_call_operand.vmem [shape: f32[8,1], index: 4, kind: input, shape index: {}]   ;;  %s10143_s5 = inlined_call_operand.vmem [shape: f32[1,1088], index: 5, kind: input, shape index: {}]   ;;  %s10144_s6 = inlined_call_operand.hbm [shape: f32[2,8,1088], index: 6, kind: output, shape index: {}]  }
   0x1   :  { %13 = vsyncpa [#allocation4 + $0x1], 0  ;;  %s8804_s21 = smov 0   ;;  %s8806_s22 = smov 0  }
   0x2   :  { %s8808_s23 = smov 0   ;;  %s8810_s24 = smov 0  }
   0x3 LB: > { %s8825_s25 = sadd.s32 4294967295, %s8754_s24   ;;  %s8144_s26 = sadd.s32 4294967294, %s8754_s24   ;;  %s8754_s24 = sphi %s8810_s24, %s10150_s24   ;;  %s8750_s23 = sphi %s8808_s23, %s10149_s23   ;;  %s8746_s22 = sphi %s8806_s22, %s10148_s22   ;;  %s8742_s21 = sphi %s8804_s21, %s10147_s21  }
   0x4   : > { %s8829_s27 = sadd.s32 1, %s8754_s24   ;;  %s157_s28 = sadd.s32 1, %s8750_s23 }
   0x5   : > { %s154_s29 = ssub.s32 %s8754_s24, %s8829_s27  ;;  %p167_p0 = scmp.ne.s32.totalorder %s8750_s23, %s8746_s22 }
   0x6   : > { %p155_p1 = scmp.eq.s32.totalorder %s154_s29, 0  ;;  %p168_p2 = scmp.eq.s32.totalorder %s8825_s25, 1 }
   0x7   : > { %p173_p3 = scmp.ne.s32.totalorder %s8746_s22, %s8742_s21  ;;  %p174_p4 = scmp.eq.s32.totalorder %s8144_s26, 1 }
   0x8   : > { %s8840_s30 = scalar_select %p155_p1, %s8750_s23, %s157_s28  }
   0x9   : > { %p8842_p5 = por %p168_p2, %p167_p0  ;;  %p8846_p6 = por %p174_p4, %p173_p3 }
   0xa   : > { %p8147_p7 = scmp.ge.s32.totalorder %s8754_s24, 1  ;;  %p215_p8 = scmp.lt.s32.totalorder %s8754_s24, 3 }
   0xc   : > { %p216_p9 = pnand %p8147_p7, %p215_p8 }
   0xd   : > { %p245_p10 = scmp.lt.s32.totalorder (!%p216_p9), %s8825_s25, 1  ;;  %v8756_v0 = vmov (!%p216_p9), 0.0   ;;  %s8757_s14 = smov (!%p216_p9), 127   ;;  %vm285_vm0 = vcmask (!%p216_p9), 1039360   ;;  %vm298_vm1 = vcmask (!%p216_p9), 1043456   ;;  %v8149_v22 = vld [vmem:[%s10139_s1 + $0x8] sm:$0xff] (!%p216_p9) }
   0xe   : > { %219 = sbr.rel (%p216_p9) target bundleno = 1198 (0x4ae), region = 44  ;;  %381 = vmatprep.mubr.f32.mxu0 (!%p216_p9), %v8756_v0  ;;  %4240 = vst [vmem:[#allocation2] sm:$0xff] (!%p216_p9), %v8756_v0  ;;  %4248 = vst [vmem:[#allocation2 + $0x40] sm:$0xff] (!%p216_p9), %v8756_v0  ;;  %452 = vmatprep.mubr.f32.mxu1 (!%p216_p9), %v8756_v0  ;;  %s8758_s15 = smov (!%p216_p9), 126   ;;  %vm294_vm2 = vcmask (!%p216_p9), 31744   ;;  %vm8765_vm3 = vmmov (!%p216_p9), 0  }
   0xf   : > { %s8759_s16 = smov (!%p216_p9), 94   ;;  %s8760_s17 = smov (!%p216_p9), 93   ;;  %v255_v37 = vld [vmem:[%s10139_s1] sm:$0xff] (!%p216_p9)  ;;  %vm1080_vm4 = vcmask (!%p216_p9), 1031168   ;;  %v8178_v48 = vld [vmem:[%s10139_s1 + $0x10] sm:$0xff] (!%p216_p9)  ;;  %vm1507_vm5 = vcmask (!%p216_p9), 769024  }
  0x10   : > { %s8761_s18 = smov (!%p216_p9), 92   ;;  %s8762_s19 = smov (!%p216_p9), 60   ;;  %v8193_v63 = vld [vmem:[%s10139_s1 + $0x18] sm:$0xff] (!%p216_p9)  ;;  %vm1934_vm6 = vcmask (!%p216_p9), 760832   ;;  %vm2361_vm7 = vcmask (!%p216_p9), 752640   ;;  %vm2791_vm8 = vcmask (!%p216_p9), 490496  }
  0x11   : > { %s8763_s20 = smov (!%p216_p9), 59   ;;  %s8764_s29 = smov (!%p216_p9), 58   ;;  %vm3222_vm9 = vcmask (!%p216_p9), 482304   ;;  %vm3653_vm10 = vcmask (!%p216_p9), 474112   ;;  %vm4137_vm11 = vcmask (!%p216_p9), 523264   ;;  %vm4249_vm12 = vcmask (!%p216_p9), 48128  }
  0x12   : > { %s8767_s28 = smov (!%p216_p9), 35   ;;  %vm4296_vm13 = vcmask (!%p216_p9), 1047832   ;;  %vm4278_vm14 = vcmask (!%p216_p9), 285696   ;;  %vm4305_vm15 = vcmask (!%p216_p9), 809984   ;;  %s8596_s11 = smul.u32 (!%p216_p9), 1152, %s8825_s25 }
  0x15   : > { %s246_s9 = scalar_select %p245_p10, %s8825_s25, 1 }
  0x16   : > { %s8768_s25 = smov [#allocation3]  }
  0x17   : > { %s8595_s10 = smul.u32 40, %s246_s9 }
  0x19   : > { %s8857_s13 = scalar_lea.vmem %s10138_s0, %s8595_s10 }
  0x1a   : > { %v8864_v1 = vld [vmem:[%s8857_s13 + $0x8] sm:$0xff]  ;;  %v8867_v2 = vld [vmem:[%s8857_s13] sm:$0xff]  ;;  %v8878_v4 = vld [vmem:[%s8857_s13 + $0x10] sm:$0xff] }
  0x1b   : > { %271 = vrot.lane.b32.xlu0 %v8864_v1, %s8757_s14  ;;  %267 = vrot.lane.b32.xlu1 %v8867_v2, %s8757_s14  ;;  %v8875_v3 = vcombine.high %v8864_v1, %v8864_v1  ;;  %v8886_v5 = vcombine.high %v8878_v4, %v8878_v4  ;;  %v8890_v6 = vcombine.high %v8867_v2, %v8867_v2  ;;  %v8893_v7 = vld [vmem:[%s8857_s13 + $0x18] sm:$0xff]  ;;  %v8908_v9 = vld [vmem:[%s8857_s13 + $0x20] sm:$0xf] }
  0x1c   : > { %v8901_v8 = vcombine.high %v8893_v7, %v8893_v7  ;;  %v1050_v10 = vld [vmem:[%s8857_s13 + $0x20] sm:$0xf] }
  0x1d   : > { %v1477_v11 = vld [vmem:[%s8857_s13 + $0x20] sm:$0xf] }
  0x1e   : > { %v1904_v12 = vld [vmem:[%s8857_s13 + $0x20] sm:$0xf] }
  0x1f   : > { %275 = vrot.lane.b32.xlu0 %v8878_v4, %s8757_s14  ;;  %273 = vrot.lane.b32.xlu1 %v8875_v3, %s8757_s14  ;;  %v2331_v13 = vld [vmem:[%s8857_s13 + $0x20] sm:$0xf] }
  0x20   : > { %v8999_v14 = vld [vmem:[%s8857_s13 + $0x20] sm:$0xff] }
  0x21   : > { %v9003_v15 = vcombine.high %v8999_v14, %v8999_v14 }
  0x23   : > { %277 = vrot.lane.b32.xlu1 %v8886_v5, %s8757_s14  ;;  %269 = vrot.lane.b32.xlu0 %v8890_v6, %s8757_s14 }
  0x27   : > { %281 = vrot.lane.b32.xlu1 %v8901_v8, %s8757_s14  ;;  %279 = vrot.lane.b32.xlu0 %v8893_v7, %s8757_s14 }
  0x2b   : > { %1064 = vrot.lane.b32.xlu1 %v8890_v6, %s8758_s15  ;;  %283 = vrot.lane.b32.xlu0 %v8908_v9, %s8757_s14 }
  0x2f   : > { %1062 = vrot.lane.b32.xlu1 %v8867_v2, %s8758_s15  ;;  %1066 = vrot.lane.b32.xlu0 %v8864_v1, %s8758_s15 }
  0x33   : > { %1070 = vrot.lane.b32.xlu1 %v8878_v4, %s8758_s15  ;;  %1068 = vrot.lane.b32.xlu0 %v8875_v3, %s8758_s15 }
  0x37   : > { %1074 = vrot.lane.b32.xlu1 %v8893_v7, %s8758_s15  ;;  %1072 = vrot.lane.b32.xlu0 %v8886_v5, %s8758_s15 }
  0x3b   : > { %1078 = vrot.lane.b32.xlu1 %v1050_v10, %s8758_s15  ;;  %1076 = vrot.lane.b32.xlu0 %v8901_v8, %s8758_s15 }
  0x3f   : > { %1497 = vrot.lane.b32.xlu1 %v8878_v4, %s8759_s16  ;;  %1495 = vrot.lane.b32.xlu0 %v8875_v3, %s8759_s16 }
  0x43   : > { %1491 = vrot.lane.b32.xlu1 %v8890_v6, %s8759_s16  ;;  %1493 = vrot.lane.b32.xlu0 %v8864_v1, %s8759_s16 }
  0x47   : > { %1503 = vrot.lane.b32.xlu1 %v8901_v8, %s8759_s16  ;;  %1489 = vrot.lane.b32.xlu0 %v8867_v2, %s8759_s16 }
  0x4b   : > { %1501 = vrot.lane.b32.xlu1 %v8893_v7, %s8759_s16  ;;  %1505 = vrot.lane.b32.xlu0 %v1477_v11, %s8759_s16 }
  0x4f   : > { %1918 = vrot.lane.b32.xlu1 %v8890_v6, %s8760_s17  ;;  %1499 = vrot.lane.b32.xlu0 %v8886_v5, %s8759_s16 }
  0x53   : > { %1916 = vrot.lane.b32.xlu1 %v8867_v2, %s8760_s17  ;;  %1920 = vrot.lane.b32.xlu0 %v8864_v1, %s8760_s17 }
  0x57   : > { %1924 = vrot.lane.b32.xlu1 %v8878_v4, %s8760_s17  ;;  %1922 = vrot.lane.b32.xlu0 %v8875_v3, %s8760_s17 }
  0x5b   : > { %1928 = vrot.lane.b32.xlu1 %v8893_v7, %s8760_s17  ;;  %1926 = vrot.lane.b32.xlu0 %v8886_v5, %s8760_s17 }
  0x5f   : > { %1932 = vrot.lane.b32.xlu1 %v1904_v12, %s8760_s17  ;;  %1930 = vrot.lane.b32.xlu0 %v8901_v8, %s8760_s17 }
  0x63   : > { %2351 = vrot.lane.b32.xlu1 %v8878_v4, %s8761_s18  ;;  %2349 = vrot.lane.b32.xlu0 %v8875_v3, %s8761_s18 }
  0x67   : > { %2345 = vrot.lane.b32.xlu1 %v8890_v6, %s8761_s18  ;;  %2347 = vrot.lane.b32.xlu0 %v8864_v1, %s8761_s18 }
  0x6b   : > { %2357 = vrot.lane.b32.xlu1 %v8901_v8, %s8761_s18  ;;  %2343 = vrot.lane.b32.xlu0 %v8867_v2, %s8761_s18 }
  0x6f   : > { %2355 = vrot.lane.b32.xlu1 %v8893_v7, %s8761_s18  ;;  %2359 = vrot.lane.b32.xlu0 %v2331_v13, %s8761_s18 }
  0x73   : > { %2773 = vrot.lane.b32.xlu1 %v8890_v6, %s8762_s19  ;;  %2353 = vrot.lane.b32.xlu0 %v8886_v5, %s8761_s18 }
  0x77   : > { %2771 = vrot.lane.b32.xlu1 %v8867_v2, %s8762_s19  ;;  %2775 = vrot.lane.b32.xlu0 %v8864_v1, %s8762_s19 }
  0x7b   : > { %2779 = vrot.lane.b32.xlu1 %v8878_v4, %s8762_s19  ;;  %2777 = vrot.lane.b32.xlu0 %v8875_v3, %s8762_s19 }
  0x7f   : > { %2783 = vrot.lane.b32.xlu1 %v8893_v7, %s8762_s19  ;;  %2781 = vrot.lane.b32.xlu0 %v8886_v5, %s8762_s19 }
  0x83   : > { %2787 = vrot.lane.b32.xlu1 %v8999_v14, %s8762_s19  ;;  %2785 = vrot.lane.b32.xlu0 %v8901_v8, %s8762_s19 }
  0x87   : > { %3208 = vrot.lane.b32.xlu1 %v8875_v3, %s8763_s20  ;;  %2789 = vrot.lane.b32.xlu0 %v9003_v15, %s8762_s19 }
  0x8b   : > { %3206 = vrot.lane.b32.xlu1 %v8864_v1, %s8763_s20  ;;  %3210 = vrot.lane.b32.xlu0 %v8878_v4, %s8763_s20 }
  0x8d   : > { %v272_v16 = vpop.permute.xlu0 %271  ;;  %v268_v17 = vpop.permute.xlu1 %267 }
  0x8f   : > { %3202 = vrot.lane.b32.xlu1 %v8867_v2, %s8763_s20  ;;  %3204 = vrot.lane.b32.xlu0 %v8890_v6, %s8763_s20 }
  0x91   : > { %v276_v18 = vpop.permute.xlu0 %275  ;;  %v274_v19 = vpop.permute.xlu1 %273 }
  0x92   : > { %v289_v20 = vsel %vm285_vm0, %v274_v19, %v276_v18  ;;  %v288_v21 = vsel %vm285_vm0, %v272_v16, %v274_v19 }
  0x93   : > { %3218 = vrot.lane.b32.xlu1 %v8999_v14, %s8763_s20  ;;  %8153 = vmatprep.subr.msk.mxu1 %vm298_vm1, %v289_v20 }
  0x94   : > { %3216 = vrot.lane.b32.xlu0 %v8901_v8, %s8763_s20  ;;  %8154 = vmatpush1.msk.msra.mxu1 %vm298_vm1, %v288_v21 }
  0x95   : > { %v278_v23 = vpop.permute.xlu1 %277  ;;  %v270_v24 = vpop.permute.xlu0 %269  ;;  %8155 = vmatmul.mubr.msk.f32.vlgmr.msra.gmra.mrb[0].mxu1 %vm294_vm2, %v8149_v22 }
  0x96   : > { %v287_v25 = vsel %vm285_vm0, %v270_v24, %v272_v16  ;;  %v286_v26 = vsel %vm285_vm0, %v268_v17, %v270_v24  ;;  %594 = vmatprep.mubr.f32.mxu1 %v8756_v0  ;;  %v290_v30 = vsel %vm285_vm0, %v276_v18, %v278_v23 }
  0x97   : > { %3212 = vrot.lane.b32.xlu1 %v8886_v5, %s8763_s20  ;;  %8150 = vmatprep.subr.msk.mxu0 %vm298_vm1, %v287_v25 }
  0x98   : > { %3214 = vrot.lane.b32.xlu0 %v8893_v7, %s8763_s20  ;;  %8151 = vmatpush1.msk.msra.mxu0 %vm298_vm1, %v286_v26 }
  0x99   : > { %v282_v27 = vpop.permute.xlu1 %281  ;;  %8152 = vmatmul.mubr.msk.f32.vlgmr.msra.gmra.mrb[0].mxu0 %vm294_vm2, %v8149_v22  ;;  %v280_v28 = vpop.permute.xlu0 %279 }
  0x9a   : > { %v291_v29 = vsel %vm285_vm0, %v278_v23, %v280_v28  ;;  %523 = vmatprep.mubr.f32.mxu0 %v8756_v0  ;;  %v292_v34 = vsel %vm285_vm0, %v280_v28, %v282_v27 }
  0x9b   : > { %3635 = vrot.lane.b32.xlu1 %v8890_v6, %s8764_s29  ;;  %8156 = vmatprep.subr.msk.mxu0 %vm298_vm1, %v291_v29 }
  0x9c   : > { %3220 = vrot.lane.b32.xlu0 %v9003_v15, %s8763_s20  ;;  %8157 = vmatpush1.msk.msra.mxu0 %vm298_vm1, %v290_v30 }
  0x9d   : > { %v1065_v31 = vpop.permute.xlu1 %1064  ;;  %8158 = vmatmul.mubr.msk.f32.vlgmr.msra.gmra.mrb[2].mxu0 %vm294_vm2, %v8149_v22  ;;  %8376 = vmatprep.subr.mxu0 %v8756_v0  ;;  %v284_v32 = vpop.permute.xlu0 %283 }
  0x9e   : > { %8377 = vmatpush3.msk.msra.mxu0 %vm298_vm1, %v284_v32  ;;  %v293_v33 = vsel %vm285_vm0, %v282_v27, %v284_v32  ;;  %8378 = vmatprep.mubr.msk.f32.mxu0 %vm8765_vm3, %v8756_v0 }
  0x9f   : > { %3633 = vrot.lane.b32.xlu1 %v8867_v2, %s8764_s29  ;;  %8159 = vmatprep.subr.msk.mxu1 %vm298_vm1, %v293_v33  ;;  %v8223_v33 = vld [vmem:[%s10139_s1 + $0x28] sm:$0xff] }
  0xa0   : > { %3637 = vrot.lane.b32.xlu0 %v8864_v1, %s8764_s29  ;;  %8160 = vmatpush1.msk.msra.mxu1 %vm298_vm1, %v292_v34 }
  0xa1   : > { %v1063_v35 = vpop.permute.xlu1 %1062  ;;  %8161 = vmatmul.mubr.msk.f32.vlgmr.msra.gmra.mrb[2].mxu1 %vm294_vm2, %v8149_v22  ;;  %8379 = vmatmul.mubr.msk.f32.vlgmr.msra.gmra.mrb[4].mxu0 %vm294_vm2, %v8149_v22  ;;  %v1067_v36 = vpop.permute.xlu0 %1066 }
  0xa2   : > { %8164 = vmatprep.subr.msk.mxu0 %vm298_vm1, %v8890_v6  ;;  %8167 = vmatprep.subr.msk.mxu1 %vm298_vm1, %v8875_v3  ;;  %v1082_v40 = vsel %vm1080_vm4, %v1065_v31, %v1067_v36  ;;  %v1081_v43 = vsel %vm1080_vm4, %v1063_v35, %v1065_v31 }
  0xa3   : > { %3641 = vrot.lane.b32.xlu1 %v8878_v4, %s8764_s29  ;;  %8165 = vmatpush1.msk.msra.mxu0 %vm298_vm1, %v8867_v2  ;;  %v8766_v2 = vmov 0  }
  0xa4   : > { %3639 = vrot.lane.b32.xlu0 %v8875_v3, %s8764_s29  ;;  %756 = vmatprep.mubr.f32.mxu0 %v8756_v0 }
  0xa5   : > { %8168 = vmatpush1.msk.msra.mxu1 %vm298_vm1, %v8864_v1  ;;  %827 = vmatprep.mubr.f32.mxu1 %v8756_v0  ;;  %v1071_v38 = vpop.permute.xlu1 %1070  ;;  %v1069_v39 = vpop.permute.xlu0 %1068  ;;  %v4047_v1 = vld [vmem:[%s10140_s2] sm:$0xff] }
  0xa6   : > { %8170 = vmatprep.subr.msk.mxu0 %vm298_vm1, %v8886_v5  ;;  %8166 = vmatmul.mubr.msk.f32.vlgmr.msra.gmra.mrb[0].mxu0 %vm294_vm2, %v255_v37  ;;  %v1084_v45 = vsel %vm1080_vm4, %v1069_v39, %v1071_v38  ;;  %v1083_v50 = vsel %vm1080_vm4, %v1067_v36, %v1069_v39 }
  0xa7   : > { %8169 = vmatmul.mubr.msk.f32.vlgmr.msra.gmra.mrb[0].mxu1 %vm294_vm2, %v255_v37  ;;  %8171 = vmatpush1.msk.msra.mxu0 %vm298_vm1, %v8878_v4 }
  0xa8   : > { %8173 = vmatprep.subr.msk.mxu1 %vm298_vm1, %v8901_v8  ;;  %8179 = vmatprep.subr.msk.mxu0 %vm298_vm1, %v1082_v40 }
  0xa9   : > { %3645 = vrot.lane.b32.xlu1 %v8893_v7, %s8764_s29  ;;  %3643 = vrot.lane.b32.xlu0 %v8886_v5, %s8764_s29  ;;  %v1075_v41 = vpop.permute.xlu1 %1074  ;;  %v1073_v42 = vpop.permute.xlu0 %1072 }
  0xaa   : > { %8174 = vmatpush1.msk.msra.mxu1 %vm298_vm1, %v8893_v7  ;;  %898 = vmatprep.mubr.f32.mxu0 %v8756_v0  ;;  %v1086_v44 = vsel %vm1080_vm4, %v1073_v42, %v1075_v41  ;;  %v1085_v51 = vsel %vm1080_vm4, %v1071_v38, %v1073_v42 }
  0xab   : > { %969 = vmatprep.mubr.f32.mxu1 %v8756_v0  ;;  %8381 = vmatprep.subr.mxu1 %v8756_v0 }
  0xac   : > { %8172 = vmatmul.mubr.msk.f32.vlgmr.msra.gmra.mrb[2].mxu0 %vm294_vm2, %v255_v37  ;;  %8175 = vmatmul.mubr.msk.f32.vlgmr.msra.gmra.mrb[2].mxu1 %vm294_vm2, %v255_v37 }
  0xad   : > { %8382 = vmatpush3.msk.msra.mxu1 %vm298_vm1, %v8908_v9  ;;  %8180 = vmatpush1.msk.msra.mxu0 %vm298_vm1, %v1081_v43  ;;  %v1079_v46 = vpop.permute.xlu1 %1078  ;;  %v1077_v47 = vpop.permute.xlu0 %1076 }
  0xae   : > { %8182 = vmatprep.subr.msk.mxu1 %vm298_vm1, %v1084_v45  ;;  %3649 = vrot.lane.b32.xlu1 %v8999_v14, %s8764_s29  ;;  %v1088_v49 = vsel %vm1080_vm4, %v1077_v47, %v1079_v46  ;;  %v1087_v55 = vsel %vm1080_vm4, %v1075_v41, %v1077_v47 }
  0xaf   : > { %3647 = vrot.lane.b32.xlu0 %v8901_v8, %s8764_s29  ;;  %8185 = vmatprep.subr.msk.mxu0 %vm298_vm1, %v1086_v44 }
  0xb0   : > { %8383 = vmatprep.mubr.msk.f32.mxu1 %vm8765_vm3, %v8756_v0  ;;  %1174 = vmatprep.mubr.f32.mxu0 %v8756_v0 }
  0xb1   : > { %8384 = vmatmul.mubr.msk.f32.vlgmr.msra.gmra.mrb[4].mxu1 %vm294_vm2, %v255_v37  ;;  %8181 = vmatmul.mubr.msk.f32.vlgmr.msra.gmra.mrb[0].mxu0 %vm294_vm2, %v8178_v48  ;;  %v1498_v52 = vpop.permute.xlu1 %1497  ;;  %v1496_v53 = vpop.permute.xlu0 %1495 }
  0xb2   : > { %8183 = vmatpush1.msk.msra.mxu1 %vm298_vm1, %v1083_v50  ;;  %8186 = vmatpush1.msk.msra.mxu0 %vm298_vm1, %v1085_v51  ;;  %v1511_v54 = vsel %vm1507_vm5, %v1496_v53, %v1498_v52  ;;  %v8238_v51 = vld [vmem:[%s10139_s1 + $0x30] sm:$0xff] }
  0xb3   : > { %3651 = vrot.lane.b32.xlu0 %v9003_v15, %s8764_s29  ;;  %8188 = vmatprep.subr.msk.mxu1 %vm298_vm1, %v1088_v49  ;;  %v8208_v15 = vld [vmem:[%s10139_s1 + $0x20] sm:$0xff] }
  0xb4   : > { %1245 = vmatprep.mubr.f32.mxu1 %v8756_v0  ;;  %1316 = vmatprep.mubr.f32.mxu0 %v8756_v0 }
  0xb5   : > { %8386 = vmatprep.subr.mxu0 %v8756_v0  ;;  %8184 = vmatmul.mubr.msk.f32.vlgmr.msra.gmra.mrb[0].mxu1 %vm294_vm2, %v8178_v48  ;;  %v1492_v56 = vpop.permute.xlu1 %1491  ;;  %v1494_v57 = vpop.permute.xlu0 %1493 }
  0xb6   : > { %8187 = vmatmul.mubr.msk.f32.vlgmr.msra.gmra.mrb[2].mxu0 %vm294_vm2, %v8178_v48  ;;  %8189 = vmatpush1.msk.msra.mxu1 %vm298_vm1, %v1087_v55  ;;  %v1509_v58 = vsel %vm1507_vm5, %v1492_v56, %v1494_v57  ;;  %v1510_v59 = vsel %vm1507_vm5, %v1494_v57, %v1496_v53 }
  0xb7   : > { %8387 = vmatpush3.msk.msra.mxu0 %vm298_vm1, %v1079_v46  ;;  %8197 = vmatprep.subr.msk.mxu1 %vm298_vm1, %v1511_v54 }
  0xb8   : > { %1387 = vmatprep.mubr.f32.mxu1 %v8756_v0  ;;  %8194 = vmatprep.subr.msk.mxu0 %vm298_vm1, %v1509_v58 }
  0xb9   : > { %8190 = vmatmul.mubr.msk.f32.vlgmr.msra.gmra.mrb[2].mxu1 %vm294_vm2, %v8178_v48  ;;  %v1504_v60 = vpop.permute.xlu1 %1503  ;;  %v1490_v61 = vpop.permute.xlu0 %1489  ;;  %8388 = vmatprep.mubr.msk.f32.mxu0 %vm8765_vm3, %v8756_v0 }
  0xba   : > { %8198 = vmatpush1.msk.msra.mxu1 %vm298_vm1, %v1510_v59  ;;  %v1508_v62 = vsel %vm1507_vm5, %v1490_v61, %v1492_v56  ;;  %8389 = vmatmul.mubr.msk.f32.vlgmr.msra.gmra.mrb[6].mxu0 %vm294_vm2, %v8178_v48 }
  0xbb   : > { %8195 = vmatpush1.msk.msra.mxu0 %vm298_vm1, %v1508_v62  ;;  %1672 = vmatprep.mubr.f32.mxu1 %v8756_v0 }
  0xbc   : > { %1601 = vmatprep.mubr.f32.mxu0 %v8756_v0  ;;  %8648 = vset.pattern.permute.xlu1 %v8766_v2 }
  0xbd   : > { %v1502_v3 = vpop.permute.xlu1 %1501  ;;  %v1506_v4 = vpop.permute.xlu0 %1505  ;;  %8199 = vmatmul.mubr.msk.f32.vlgmr.msra.gmra.mrb[0].mxu1 %vm294_vm2, %v8193_v63  ;;  %4050 = vperm.xlu1 %8648, %v4047_v1  }
  0xbe   : > { %v1514_v5 = vsel %vm1507_vm5, %v1502_v3, %v1504_v60  ;;  %v1515_v6 = vsel %vm1507_vm5, %v1504_v60, %v1506_v4  ;;  %1814 = vmatprep.mubr.f32.mxu1 %v8756_v0  ;;  %8196 = vmatmul.mubr.msk.f32.vlgmr.msra.gmra.mrb[0].mxu0 %vm294_vm2, %v8193_v63 }
  0xbf   : > { %8203 = vmatprep.subr.msk.mxu1 %vm298_vm1, %v1515_v6  ;;  %1743 = vmatprep.mubr.f32.mxu0 %v8756_v0 }
  0xc0   : > { %8204 = vmatpush1.msk.msra.mxu1 %vm298_vm1, %v1514_v5  ;;  %8649 = vset.pattern.permute.xlu0 %v8766_v2 }
  0xc1   : > { %v1919_v7 = vpop.permute.xlu1 %1918  ;;  %8391 = vmatprep.subr.mxu1 %v8756_v0  ;;  %v1500_v8 = vpop.permute.xlu0 %1499  ;;  %8205 = vmatmul.mubr.msk.f32.vlgmr.msra.gmra.mrb[2].mxu1 %vm294_vm2, %v8193_v63 }
  0xc2   : > { %v1512_v9 = vsel %vm1507_vm5, %v1498_v52, %v1500_v8  ;;  %8392 = vmatpush3.msk.msra.mxu1 %vm298_vm1, %v1506_v4  ;;  %v1513_v10 = vsel %vm1507_vm5, %v1500_v8, %v1502_v3  ;;  %8393 = vmatprep.mubr.msk.f32.mxu1 %vm8765_vm3, %v8756_v0  ;;  %v8253_v8 = vld [vmem:[%s10139_s1 + $0x38] sm:$0xff] }
  0xc3   : > { %8200 = vmatprep.subr.msk.mxu0 %vm298_vm1, %v1513_v10 }
  0xc4   : > { %8201 = vmatpush1.msk.msra.mxu0 %vm298_vm1, %v1512_v9 }
  0xc5   : > { %v1917_v11 = vpop.permute.xlu1 %1916  ;;  %v1921_v12 = vpop.permute.xlu0 %1920  ;;  %8202 = vmatmul.mubr.msk.f32.vlgmr.msra.gmra.mrb[2].mxu0 %vm294_vm2, %v8193_v63  ;;  %8394 = vmatmul.mubr.msk.f32.vlgmr.msra.gmra.mrb[6].mxu1 %vm294_vm2, %v8193_v63 }
  0xc6   : > { %v1935_v13 = vsel %vm1934_vm6, %v1917_v11, %v1919_v7  ;;  %v1936_v14 = vsel %vm1934_vm6, %v1919_v7, %v1921_v12  ;;  %2028 = vmatprep.mubr.f32.mxu0 %v8756_v0  ;;  %2099 = vmatprep.mubr.f32.mxu1 %v8756_v0 }
  0xc7   : > { %8209 = vmatprep.subr.msk.mxu0 %vm298_vm1, %v1936_v14 }
  0xc8   : > { %8210 = vmatpush1.msk.msra.mxu0 %vm298_vm1, %v1935_v13 }
  0xc9   : > { %v1925_v16 = vpop.permute.xlu1 %1924  ;;  %v1923_v17 = vpop.permute.xlu0 %1922  ;;  %8211 = vmatmul.mubr.msk.f32.vlgmr.msra.gmra.mrb[0].mxu0 %vm294_vm2, %v8208_v15 }
  0xca   : > { %v1937_v18 = vsel %vm1934_vm6, %v1921_v12, %v1923_v17  ;;  %v1938_v19 = vsel %vm1934_vm6, %v1923_v17, %v1925_v16  ;;  %2170 = vmatprep.mubr.f32.mxu0 %v8756_v0 }
  0xcb   : > { %8212 = vmatprep.subr.msk.mxu1 %vm298_vm1, %v1938_v19 }
  0xcc   : > { %8213 = vmatpush1.msk.msra.mxu1 %vm298_vm1, %v1937_v18 }
  0xcd   : > { %v1929_v20 = vpop.permute.xlu1 %1928  ;;  %v1927_v21 = vpop.permute.xlu0 %1926  ;;  %8214 = vmatmul.mubr.msk.f32.vlgmr.msra.gmra.mrb[0].mxu1 %vm294_vm2, %v8208_v15 }
  0xce   : > { %v1939_v22 = vsel %vm1934_vm6, %v1925_v16, %v1927_v21  ;;  %v1940_v23 = vsel %vm1934_vm6, %v1927_v21, %v1929_v20  ;;  %2241 = vmatprep.mubr.f32.mxu1 %v8756_v0 }
  0xcf   : > { %8215 = vmatprep.subr.msk.mxu0 %vm298_vm1, %v1940_v23 }
  0xd0   : > { %8216 = vmatpush1.msk.msra.mxu0 %vm298_vm1, %v1939_v22 }
  0xd1   : > { %v1933_v24 = vpop.permute.xlu1 %1932  ;;  %8217 = vmatmul.mubr.msk.f32.vlgmr.msra.gmra.mrb[2].mxu0 %vm294_vm2, %v8208_v15  ;;  %v1931_v25 = vpop.permute.xlu0 %1930  ;;  %8396 = vmatprep.subr.mxu0 %v8756_v0 }
  0xd2   : > { %v1941_v26 = vsel %vm1934_vm6, %v1929_v20, %v1931_v25  ;;  %v1942_v27 = vsel %vm1934_vm6, %v1931_v25, %v1933_v24  ;;  %8397 = vmatpush3.msk.msra.mxu0 %vm298_vm1, %v1933_v24  ;;  %8398 = vmatprep.mubr.msk.f32.mxu0 %vm8765_vm3, %v8756_v0 }
  0xd3   : > { %8218 = vmatprep.subr.msk.mxu1 %vm298_vm1, %v1942_v27 }
  0xd4   : > { %8219 = vmatpush1.msk.msra.mxu1 %vm298_vm1, %v1941_v26 }
  0xd5   : > { %v2352_v28 = vpop.permute.xlu1 %2351  ;;  %8399 = vmatmul.mubr.msk.f32.vlgmr.msra.gmra.mrb[8].mxu0 %vm294_vm2, %v8208_v15  ;;  %v2350_v29 = vpop.permute.xlu0 %2349  ;;  %8220 = vmatmul.mubr.msk.f32.vlgmr.msra.gmra.mrb[2].mxu1 %vm294_vm2, %v8208_v15 }
  0xd6   : > { %v2365_v30 = vsel %vm2361_vm7, %v2350_v29, %v2352_v28  ;;  %2526 = vmatprep.mubr.f32.mxu1 %v8756_v0  ;;  %2455 = vmatprep.mubr.f32.mxu0 %v8756_v0 }
  0xd7   : > { %8227 = vmatprep.subr.msk.mxu1 %vm298_vm1, %v2365_v30 }
  0xd9   : > { %v2346_v31 = vpop.permute.xlu1 %2345  ;;  %v2348_v32 = vpop.permute.xlu0 %2347 }
  0xda   : > { %v2364_v34 = vsel %vm2361_vm7, %v2348_v32, %v2350_v29  ;;  %v2363_v35 = vsel %vm2361_vm7, %v2346_v31, %v2348_v32 }
  0xdb   : > { %8224 = vmatprep.subr.msk.mxu0 %vm298_vm1, %v2363_v35  ;;  %8228 = vmatpush1.msk.msra.mxu1 %vm298_vm1, %v2364_v34 }
  0xdc   : > { %8229 = vmatmul.mubr.msk.f32.vlgmr.msra.gmra.mrb[0].mxu1 %vm294_vm2, %v8223_v33 }
  0xdd   : > { %v2358_v36 = vpop.permute.xlu1 %2357  ;;  %v2344_v37 = vpop.permute.xlu0 %2343  ;;  %2668 = vmatprep.mubr.f32.mxu1 %v8756_v0 }
  0xde   : > { %v2362_v38 = vsel %vm2361_vm7, %v2344_v37, %v2346_v31 }
  0xdf   : > { %8225 = vmatpush1.msk.msra.mxu0 %vm298_vm1, %v2362_v38 }
  0xe0   : > { %8226 = vmatmul.mubr.msk.f32.vlgmr.msra.gmra.mrb[0].mxu0 %vm294_vm2, %v8223_v33 }
  0xe1   : > { %v2356_v39 = vpop.permute.xlu1 %2355  ;;  %v2360_v40 = vpop.permute.xlu0 %2359  ;;  %2597 = vmatprep.mubr.f32.mxu0 %v8756_v0 }
  0xe2   : > { %v2368_v41 = vsel %vm2361_vm7, %v2356_v39, %v2358_v36  ;;  %v2369_v42 = vsel %vm2361_vm7, %v2358_v36, %v2360_v40 }
  0xe3   : > { %8233 = vmatprep.subr.msk.mxu1 %vm298_vm1, %v2369_v42 }
  0xe4   : > { %8234 = vmatpush1.msk.msra.mxu1 %vm298_vm1, %v2368_v41 }
  0xe5   : > { %v2774_v43 = vpop.permute.xlu1 %2773  ;;  %8235 = vmatmul.mubr.msk.f32.vlgmr.msra.gmra.mrb[2].mxu1 %vm294_vm2, %v8223_v33  ;;  %8401 = vmatprep.subr.mxu1 %v8756_v0  ;;  %v2354_v44 = vpop.permute.xlu0 %2353 }
  0xe6   : > { %v2366_v45 = vsel %vm2361_vm7, %v2352_v28, %v2354_v44  ;;  %8402 = vmatpush3.msk.msra.mxu1 %vm298_vm1, %v2360_v40  ;;  %v2367_v46 = vsel %vm2361_vm7, %v2354_v44, %v2356_v39  ;;  %8403 = vmatprep.mubr.msk.f32.mxu1 %vm8765_vm3, %v8756_v0  ;;  %v8268_v28 = vld [vmem:[%s10139_s1 + $0x40] sm:$0xff] }
  0xe7   : > { %8230 = vmatprep.subr.msk.mxu0 %vm298_vm1, %v2367_v46 }
  0xe8   : > { %8231 = vmatpush1.msk.msra.mxu0 %vm298_vm1, %v2366_v45 }
  0xe9   : > { %v2772_v47 = vpop.permute.xlu1 %2771  ;;  %8404 = vmatmul.mubr.msk.f32.vlgmr.msra.gmra.mrb[8].mxu1 %vm294_vm2, %v8223_v33  ;;  %v2776_v48 = vpop.permute.xlu0 %2775  ;;  %8232 = vmatmul.mubr.msk.f32.vlgmr.msra.gmra.mrb[2].mxu0 %vm294_vm2, %v8223_v33 }
  0xea   : > { %v2792_v49 = vsel %vm2791_vm8, %v2772_v47, %v2774_v43  ;;  %v2793_v50 = vsel %vm2791_vm8, %v2774_v43, %v2776_v48  ;;  %2886 = vmatprep.mubr.f32.mxu0 %v8756_v0  ;;  %2957 = vmatprep.mubr.f32.mxu1 %v8756_v0 }
  0xeb   : > { %8239 = vmatprep.subr.msk.mxu0 %vm298_vm1, %v2793_v50 }
  0xec   : > { %8240 = vmatpush1.msk.msra.mxu0 %vm298_vm1, %v2792_v49 }
  0xed   : > { %v2780_v52 = vpop.permute.xlu1 %2779  ;;  %v2778_v53 = vpop.permute.xlu0 %2777  ;;  %8241 = vmatmul.mubr.msk.f32.vlgmr.msra.gmra.mrb[0].mxu0 %vm294_vm2, %v8238_v51 }
  0xee   : > { %v2794_v54 = vsel %vm2791_vm8, %v2776_v48, %v2778_v53  ;;  %v2795_v55 = vsel %vm2791_vm8, %v2778_v53, %v2780_v52  ;;  %3028 = vmatprep.mubr.f32.mxu0 %v8756_v0 }
  0xef   : > { %8242 = vmatprep.subr.msk.mxu1 %vm298_vm1, %v2795_v55 }
  0xf0   : > { %8243 = vmatpush1.msk.msra.mxu1 %vm298_vm1, %v2794_v54 }
  0xf1   : > { %v2784_v56 = vpop.permute.xlu1 %2783  ;;  %v2782_v57 = vpop.permute.xlu0 %2781  ;;  %8244 = vmatmul.mubr.msk.f32.vlgmr.msra.gmra.mrb[0].mxu1 %vm294_vm2, %v8238_v51 }
  0xf2   : > { %v2796_v58 = vsel %vm2791_vm8, %v2780_v52, %v2782_v57  ;;  %v2797_v59 = vsel %vm2791_vm8, %v2782_v57, %v2784_v56  ;;  %3099 = vmatprep.mubr.f32.mxu1 %v8756_v0 }
  0xf3   : > { %8245 = vmatprep.subr.msk.mxu0 %vm298_vm1, %v2797_v59 }
  0xf4   : > { %8246 = vmatpush1.msk.msra.mxu0 %vm298_vm1, %v2796_v58 }
  0xf5   : > { %v2788_v60 = vpop.permute.xlu1 %2787  ;;  %v2786_v61 = vpop.permute.xlu0 %2785  ;;  %8247 = vmatmul.mubr.msk.f32.vlgmr.msra.gmra.mrb[2].mxu0 %vm294_vm2, %v8238_v51  ;;  %8406 = vmatprep.subr.mxu0 %v8756_v0 }
  0xf6   : > { %v2798_v62 = vsel %vm2791_vm8, %v2784_v56, %v2786_v61  ;;  %v2799_v63 = vsel %vm2791_vm8, %v2786_v61, %v2788_v60  ;;  %8408 = vmatprep.mubr.msk.f32.mxu0 %vm8765_vm3, %v8756_v0 }
  0xf7   : > { %8248 = vmatprep.subr.msk.mxu1 %vm298_vm1, %v2799_v63 }
  0xf8   : > { %8249 = vmatpush1.msk.msra.mxu1 %vm298_vm1, %v2798_v62 }
  0xf9   : > { %v3209_v1 = vpop.permute.xlu1 %3208  ;;  %v2790_v2 = vpop.permute.xlu0 %2789  ;;  %8250 = vmatmul.mubr.msk.f32.vlgmr.msra.gmra.mrb[2].mxu1 %vm294_vm2, %v8238_v51 }
  0xfa   : > { %v2800_v3 = vsel %vm2791_vm8, %v2788_v60, %v2790_v2  ;;  %3388 = vmatprep.mubr.f32.mxu1 %v8756_v0 }
  0xfb   : > { %8407 = vmatpush3.msk.msra.mxu0 %vm298_vm1, %v2800_v3 }
  0xfc   : > { %8409 = vmatmul.mubr.msk.f32.vlgmr.msra.gmra.mrb[10].mxu0 %vm294_vm2, %v8238_v51 }
  0xfd   : > { %v3207_v4 = vpop.permute.xlu1 %3206  ;;  %v3211_v5 = vpop.permute.xlu0 %3210  ;;  %3317 = vmatprep.mubr.f32.mxu0 %v8756_v0 }
  0xfe   : > { %v3225_v6 = vsel %vm3222_vm9, %v3207_v4, %v3209_v1  ;;  %v3226_v7 = vsel %vm3222_vm9, %v3209_v1, %v3211_v5 }
  0xff   : > { %8257 = vmatprep.subr.msk.mxu1 %vm298_vm1, %v3226_v7 }
 0x100   : > { %8258 = vmatpush1.msk.msra.mxu1 %vm298_vm1, %v3225_v6 }
 0x101   : > { %v3203_v9 = vpop.permute.xlu1 %3202  ;;  %v3205_v10 = vpop.permute.xlu0 %3204  ;;  %8259 = vmatmul.mubr.msk.f32.vlgmr.msra.gmra.mrb[0].mxu1 %vm294_vm2, %v8253_v8 }
 0x102   : > { %v3223_v11 = vsel %vm3222_vm9, %v3203_v9, %v3205_v10  ;;  %v3224_v12 = vsel %vm3222_vm9, %v3205_v10, %v3207_v4  ;;  %3530 = vmatprep.mubr.f32.mxu1 %v8756_v0 }
 0x103   : > { %8254 = vmatprep.subr.msk.mxu0 %vm298_vm1, %v3224_v12 }
 0x104   : > { %8255 = vmatpush1.msk.msra.mxu0 %vm298_vm1, %v3223_v11 }
 0x105   : > { %v3219_v13 = vpop.permute.xlu1 %3218  ;;  %8256 = vmatmul.mubr.msk.f32.vlgmr.msra.gmra.mrb[0].mxu0 %vm294_vm2, %v8253_v8 }
 0x106   : > { %v3217_v14 = vpop.permute.xlu0 %3216  ;;  %3459 = vmatprep.mubr.f32.mxu0 %v8756_v0 }
 0x107   : > { %v3230_v15 = vsel %vm3222_vm9, %v3217_v14, %v3219_v13 }
 0x108   : > { %8263 = vmatprep.subr.msk.mxu1 %vm298_vm1, %v3230_v15 }
 0x109   : > { %v3213_v16 = vpop.permute.xlu1 %3212 }
 0x10a   : > { %v3227_v17 = vsel %vm3222_vm9, %v3211_v5, %v3213_v16  ;;  %v3215_v18 = vpop.permute.xlu0 %3214 }
 0x10b   : > { %v3229_v19 = vsel %vm3222_vm9, %v3215_v18, %v3217_v14  ;;  %v3228_v20 = vsel %vm3222_vm9, %v3213_v16, %v3215_v18 }
 0x10c   : > { %8260 = vmatprep.subr.msk.mxu0 %vm298_vm1, %v3228_v20  ;;  %8264 = vmatpush1.msk.msra.mxu1 %vm298_vm1, %v3229_v19 }
 0x10d   : > { %8261 = vmatpush1.msk.msra.mxu0 %vm298_vm1, %v3227_v17  ;;  %8265 = vmatmul.mubr.msk.f32.vlgmr.msra.gmra.mrb[2].mxu1 %vm294_vm2, %v8253_v8  ;;  %v3636_v21 = vpop.permute.xlu1 %3635 }
 0x10e   : > { %v3221_v22 = vpop.permute.xlu0 %3220  ;;  %8411 = vmatprep.subr.mxu1 %v8756_v0  ;;  %8413 = vmatprep.mubr.msk.f32.mxu1 %vm8765_vm3, %v8756_v0 }
 0x10f   : > { %v3231_v23 = vsel %vm3222_vm9, %v3219_v13, %v3221_v22  ;;  %8262 = vmatmul.mubr.msk.f32.vlgmr.msra.gmra.mrb[2].mxu0 %vm294_vm2, %v8253_v8 }
 0x110   : > { %8412 = vmatpush3.msk.msra.mxu1 %vm298_vm1, %v3231_v23  ;;  %3748 = vmatprep.mubr.f32.mxu0 %v8756_v0 }
 0x111   : > { %8414 = vmatmul.mubr.msk.f32.vlgmr.msra.gmra.mrb[10].mxu1 %vm294_vm2, %v8253_v8  ;;  %v3634_v24 = vpop.permute.xlu1 %3633 }
 0x112   : > { %v3654_v25 = vsel %vm3653_vm10, %v3634_v24, %v3636_v21  ;;  %v3638_v26 = vpop.permute.xlu0 %3637  ;;  %3819 = vmatprep.mubr.f32.mxu1 %v8756_v0 }
 0x113   : > { %v3655_v27 = vsel %vm3653_vm10, %v3636_v21, %v3638_v26 }
 0x114   : > { %8269 = vmatprep.subr.msk.mxu0 %vm298_vm1, %v3655_v27 }
 0x115   : > { %8270 = vmatpush1.msk.msra.mxu0 %vm298_vm1, %v3654_v25  ;;  %v3642_v29 = vpop.permute.xlu1 %3641 }
 0x116   : > { %8271 = vmatmul.mubr.msk.f32.vlgmr.msra.gmra.mrb[0].mxu0 %vm294_vm2, %v8268_v28  ;;  %v3640_v30 = vpop.permute.xlu0 %3639 }
 0x117   : > { %v3656_v31 = vsel %vm3653_vm10, %v3638_v26, %v3640_v30  ;;  %v3657_v32 = vsel %vm3653_vm10, %v3640_v30, %v3642_v29  ;;  %3890 = vmatprep.mubr.f32.mxu0 %v8756_v0 }
 0x118   : > { %8272 = vmatprep.subr.msk.mxu1 %vm298_vm1, %v3657_v32 }
 0x119   : > { %8273 = vmatpush1.msk.msra.mxu1 %vm298_vm1, %v3656_v31 }
 0x11a   : > { %8274 = vmatmul.mubr.msk.f32.vlgmr.msra.gmra.mrb[0].mxu1 %vm294_vm2, %v8268_v28 }
 0x11b   : > { %v3646_v33 = vpop.permute.xlu1 %3645  ;;  %v3644_v34 = vpop.permute.xlu0 %3643  ;;  %3961 = vmatprep.mubr.f32.mxu1 %v8756_v0 }
 0x11c   : > { %v3658_v35 = vsel %vm3653_vm10, %v3642_v29, %v3644_v34  ;;  %v3659_v36 = vsel %vm3653_vm10, %v3644_v34, %v3646_v33  ;;  %v4186_v29 = vlaneseq }
 0x11d   : > { %8275 = vmatprep.subr.msk.mxu0 %vm298_vm1, %v3659_v36 }
 0x11e   : > { %8276 = vmatpush1.msk.msra.mxu0 %vm298_vm1, %v3658_v35 }
 0x11f   : > { %8277 = vmatmul.mubr.msk.f32.vlgmr.msra.gmra.mrb[2].mxu0 %vm294_vm2, %v8268_v28  ;;  %8416 = vmatprep.subr.mxu0 %v8756_v0 }
 0x120   : > { %v3650_v37 = vpop.permute.xlu1 %3649  ;;  %8418 = vmatprep.mubr.msk.f32.mxu0 %vm8765_vm3, %v8756_v0 }
 0x121   : > { %v3648_v38 = vpop.permute.xlu0 %3647 }
 0x122   : > { %v3660_v39 = vsel %vm3653_vm10, %v3646_v33, %v3648_v38  ;;  %v3661_v40 = vsel %vm3653_vm10, %v3648_v38, %v3650_v37 }
 0x123   : > { %8278 = vmatprep.subr.msk.mxu1 %vm298_vm1, %v3661_v40 }
 0x124   : > { %8279 = vmatpush1.msk.msra.mxu1 %vm298_vm1, %v3660_v39 }
 0x125   : > { %8280 = vmatmul.mubr.msk.f32.vlgmr.msra.gmra.mrb[2].mxu1 %vm294_vm2, %v8268_v28  ;;  %v3652_v41 = vpop.permute.xlu0 %3651 }
 0x126   : > { %v3662_v42 = vsel %vm3653_vm10, %v3650_v37, %v3652_v41  ;;  %4431 = vmatprep.mubr.f32.mxu1 %v8756_v0 }
 0x127   : > { %8417 = vmatpush3.msk.msra.mxu0 %vm298_vm1, %v3662_v42  ;;  %vm4363_vm1 = vcmask 64512  }
 0x128   : > { %8419 = vmatmul.mubr.msk.f32.vlgmr.msra.gmra.mrb[12].mxu0 %vm294_vm2, %v8268_v28 }
 0x129   : > { %4502 = vmatprep.mubr.f32.mxu0 %v8756_v0 }
 0x13c   : > { %v9348_v2 = vpop.permute.xlu1 %4050 }
 0x174   : > { %v667_v43 = vpop.f32.mrb[4].mxu0 }
 0x175   : > { %v8380_v44 = vpop.f32.mrb[5].mxu0 }
 0x184   : > { %v1042_v45 = vpop.f32.mrb[4].mxu1 }
 0x185   : > { %v1043_v46 = vadd.f32 %v1042_v45, %v667_v43  ;;  %v8385_v47 = vpop.f32.mrb[5].mxu1  ;;  %v9376_v43 = vshrl.u32 %v4186_v29, 7 }
 0x18d   : > { %v1460_v48 = vpop.f32.mrb[6].mxu0 }
 0x18e   : > { %v1472_v49 = vadd.f32 %v1460_v48, %v1043_v46  ;;  %v8390_v50 = vpop.f32.mrb[7].mxu0 }
 0x198   : > { %v1887_v51 = vpop.f32.mrb[6].mxu1 }
 0x199   : > { %v1899_v52 = vadd.f32 %v1887_v51, %v1472_v49  ;;  %v8395_v53 = vpop.f32.mrb[7].mxu1 }
 0x1a8   : > { %v2314_v54 = vpop.f32.mrb[8].mxu0 }
 0x1a9   : > { %v2326_v55 = vadd.f32 %v2314_v54, %v1899_v52  ;;  %v8400_v56 = vpop.f32.mrb[9].mxu0 }
 0x1bc   : > { %v2741_v57 = vpop.f32.mrb[8].mxu1 }
 0x1bd   : > { %v2753_v58 = vadd.f32 %v2741_v57, %v2326_v55  ;;  %v8405_v59 = vpop.f32.mrb[9].mxu1 }
 0x1cf   : > { %v3172_v60 = vpop.f32.mrb[10].mxu0 }
 0x1d0   : > { %v3184_v61 = vadd.f32 %v3172_v60, %v2753_v58  ;;  %v8410_v0 = vpop.f32.mrb[11].mxu0 }
 0x1e4   : > { %v3603_v62 = vpop.f32.mrb[10].mxu1 }
 0x1e5   : > { %v9346_v63 = vadd.f32 %v3603_v62, %v3184_v61  ;;  %v8415_v1 = vpop.f32.mrb[11].mxu1 }
 0x1e9   : > { %v3750_v3 = vpop.f32.mrb[0].mxu0 }
 0x1ea   : > { %v4053_v4 = vadd.f32 %v9348_v2, %v3750_v3  ;;  %v3752_v5 = vpop.f32.mrb[1].mxu0 }
 0x1eb   : > { %v4054_v6 = vadd.f32 %v9348_v2, %v3752_v5 }
 0x1ec   : > { %v4062_v7 = vmul.f32 0.2, %v4053_v4 }
 0x1ed   : > { %v4063_v8 = vmul.f32 0.2, %v4054_v6  ;;  %v3821_v9 = vpop.f32.mrb[0].mxu1 }
 0x1ee   : > { %v9352_v10 = vmax.f32 %v4053_v4, %v4062_v7  ;;  %v4055_v11 = vadd.f32 %v9348_v2, %v3821_v9  ;;  %v3823_v12 = vpop.f32.mrb[1].mxu1 }
 0x1ef   : > { %v9355_v13 = vmax.f32 %v4054_v6, %v4063_v8  ;;  %v4056_v14 = vadd.f32 %v9348_v2, %v3823_v12 }
 0x1f0   : > { %v4080_v15 = vmul.f32 %v9352_v10, %v9352_v10  ;;  %v4064_v16 = vmul.f32 0.2, %v4055_v11 }
 0x1f1   : > { %v4081_v17 = vmul.f32 %v9355_v13, %v9355_v13  ;;  %v4065_v18 = vmul.f32 0.2, %v4056_v14 }
 0x1f2   : > { %v4089_v19 = vrot.slane %v4080_v15, 4  ;;  %v9362_v20 = vmax.f32 %v4055_v11, %v4064_v16  ;;  %v3892_v21 = vpop.f32.mrb[2].mxu0 }
 0x1f3   : > { %v4095_v22 = vrot.slane %v4081_v17, 4  ;;  %v9364_v23 = vmax.f32 %v4056_v14, %v4065_v18  ;;  %v4057_v24 = vadd.f32 %v9348_v2, %v3892_v21  ;;  %v3894_v25 = vpop.f32.mrb[3].mxu0 }
 0x1f4   : > { %v4090_v26 = vadd.f32 %v4089_v19, %v4080_v15  ;;  %v4082_v27 = vmul.f32 %v9362_v20, %v9362_v20  ;;  %v4058_v28 = vadd.f32 %v9348_v2, %v3894_v25 }
 0x1f5   : > { %v4096_v30 = vadd.f32 %v4095_v22, %v4081_v17  ;;  %v4083_v31 = vmul.f32 %v9364_v23, %v9364_v23  ;;  %v4066_v32 = vmul.f32 0.2, %v4057_v24 }
 0x1f6   : > { %v4091_v33 = vrot.slane %v4090_v26, 2  ;;  %v4101_v34 = vrot.slane %v4082_v27, 4  ;;  %v4067_v35 = vmul.f32 0.2, %v4058_v28 }
 0x1f7   : > { %v4097_v36 = vrot.slane %v4096_v30, 2  ;;  %v4107_v37 = vrot.slane %v4083_v31, 4  ;;  %v9372_v38 = vmax.f32 %v4057_v24, %v4066_v32 }
 0x1f8   : > { %v4092_v39 = vadd.f32 %v4091_v33, %v4090_v26  ;;  %v4102_v40 = vadd.f32 %v4101_v34, %v4082_v27  ;;  %v9374_v41 = vmax.f32 %v4058_v28, %v4067_v35  ;;  %v3963_v42 = vpop.f32.mrb[2].mxu1 }
 0x1f9   : > { %v4098_v44 = vadd.f32 %v4097_v36, %v4096_v30  ;;  %v4108_v45 = vadd.f32 %v4107_v37, %v4083_v31  ;;  %v4084_v46 = vmul.f32 %v9372_v38, %v9372_v38  ;;  %v4059_v47 = vadd.f32 %v9348_v2, %v3963_v42  ;;  %v3965_v48 = vpop.f32.mrb[3].mxu1 }
 0x1fa   : > { %v4093_v49 = vrot.slane %v4092_v39, 1  ;;  %v4103_v50 = vrot.slane %v4102_v40, 2  ;;  %v4085_v51 = vmul.f32 %v9374_v41, %v9374_v41  ;;  %v4060_v52 = vadd.f32 %v9348_v2, %v3965_v48 }
 0x1fb   : > { %v4099_v53 = vrot.slane %v4098_v44, 1  ;;  %v4109_v54 = vrot.slane %v4108_v45, 2  ;;  %v4113_v55 = vrot.slane %v4084_v46, 4  ;;  %v4068_v56 = vmul.f32 0.2, %v4059_v47  ;;  %v4034_v57 = vpop.f32.mrb[12].mxu0 }
 0x1fc   : > { %v4094_v58 = vadd.f32 %v4093_v49, %v4092_v39  ;;  %v4104_v59 = vadd.f32 %v4103_v50, %v4102_v40  ;;  %v4119_v60 = vrot.slane %v4085_v51, 4  ;;  %v4069_v61 = vmul.f32 0.2, %v4060_v52  ;;  %v8420_v0 = vpop.f32.mrb[13].mxu0 }
 0x1fd   : > { %v4100_v62 = vadd.f32 %v4099_v53, %v4098_v44  ;;  %v4110_v1 = vadd.f32 %v4109_v54, %v4108_v45  ;;  %v4114_v3 = vadd.f32 %v4113_v55, %v4084_v46  ;;  %v9384_v4 = vmax.f32 %v4059_v47, %v4068_v56 }
 0x1fe   : > { %v4146_v5 = vmul.f32 0.125, %v4094_v58  ;;  %v4105_v6 = vrot.slane %v4104_v59, 1  ;;  %v4120_v7 = vadd.f32 %v4119_v60, %v4085_v51  ;;  %v9386_v8 = vmax.f32 %v4060_v52, %v4069_v61 }
 0x1ff   : > { %v4147_v9 = vmul.f32 0.125, %v4100_v62  ;;  %v4111_v11 = vrot.slane %v4110_v1, 1  ;;  %v4115_v12 = vrot.slane %v4114_v3, 2  ;;  %v4086_v14 = vmul.f32 %v9384_v4, %v9384_v4 }
 0x200   : > { %v4155_v15 = vadd.f32 1e-08, %v4146_v5  ;;  %v4106_v16 = vadd.f32 %v4105_v6, %v4104_v59  ;;  %v4121_v17 = vrot.slane %v4120_v7, 2  ;;  %v4087_v18 = vmul.f32 %v9386_v8, %v9386_v8 }
 0x201   : > { %v4156_v19 = vadd.f32 1e-08, %v4147_v9  ;;  %v4112_v21 = vadd.f32 %v4111_v11, %v4110_v1  ;;  %v4116_v22 = vadd.f32 %v4115_v12, %v4114_v3  ;;  %v4125_v24 = vrot.slane %v4086_v14, 4 }
 0x202   : > { %8655 = vrsqrt.f32 %v4155_v15  ;;  %v4148_v25 = vmul.f32 0.125, %v4106_v16  ;;  %v4122_v26 = vadd.f32 %v4121_v17, %v4120_v7  ;;  %v4131_v27 = vrot.slane %v4087_v18, 4 }
 0x203   : > { %8657 = vrsqrt.f32 %v4156_v19  ;;  %v4149_v28 = vmul.f32 0.125, %v4112_v21  ;;  %v4117_v29 = vrot.slane %v4116_v22, 1  ;;  %v4126_v30 = vadd.f32 %v4125_v24, %v4086_v14 }
 0x204   : > { %v4157_v31 = vadd.f32 1e-08, %v4148_v25  ;;  %v4123_v32 = vrot.slane %v4122_v26, 1  ;;  %v4132_v33 = vadd.f32 %v4131_v27, %v4087_v18  ;;  %v4046_v34 = vadd.f32 %v4034_v57, %v9346_v63  ;;  %v9398_v63 = vld [vmem:[%s10143_s5] sm:$0xff] }
 0x205   : > { %v4158_v35 = vadd.f32 1e-08, %v4149_v28  ;;  %v4118_v36 = vadd.f32 %v4117_v29, %v4116_v22  ;;  %v4127_v37 = vrot.slane %v4126_v30, 2  ;;  %v4188_v46 = vsub.s32 0, %v9376_v43 }
 0x206   : > { %8659 = vrsqrt.f32 %v4157_v31  ;;  %v4124_v39 = vadd.f32 %v4123_v32, %v4122_v26  ;;  %v4133_v40 = vrot.slane %v4132_v33, 2  ;;  %v4061_v42 = vadd.f32 %v9348_v2, %v4046_v34 }
 0x207   : > { %8661 = vrsqrt.f32 %v4158_v35  ;;  %v4150_v44 = vmul.f32 0.125, %v4118_v36  ;;  %v4128_v45 = vadd.f32 %v4127_v37, %v4126_v30  ;;  %v4192_v50 = vsub.s32 1, %v9376_v43 }
 0x208   : > { %v4151_v47 = vmul.f32 0.125, %v4124_v39  ;;  %v4134_v48 = vadd.f32 %v4133_v40, %v4132_v33  ;;  %v4070_v49 = vmul.f32 0.2, %v4061_v42  ;;  %v4189_v56 = vrot.slane %v9398_v63, %v4188_v46 }
 0x209   : > { %v4159_v51 = vadd.f32 1e-08, %v4150_v44  ;;  %v4129_v52 = vrot.slane %v4128_v45, 1  ;;  %v4196_v57 = vsub.s32 2, %v9376_v43  ;;  %v4193_v61 = vrot.slane %v9398_v63, %v4192_v50  ;;  %v8283_v50 = vld [vmem:[%s10143_s5 + $0x8] ss:$0 sm:$0xff] }
 0x20a   : > { %v4160_v53 = vadd.f32 1e-08, %v4151_v47  ;;  %v4135_v54 = vrot.slane %v4134_v48, 1  ;;  %v9401_v2 = vmax.f32 %v4061_v42, %v4070_v49  ;;  %v4200_v7 = vsub.s32 3, %v9376_v43 }
 0x20b   : > { %8663 = vrsqrt.f32 %v4159_v51  ;;  %v4130_v55 = vadd.f32 %v4129_v52, %v4128_v45  ;;  %v4197_v14 = vrot.slane %v9398_v63, %v4196_v57  ;;  %v4204_v18 = vsub.s32 4, %v9376_v43 }
 0x20c   : > { %v8656_v58 = vpop.eup %8655  ;;  %8665 = vrsqrt.f32 %v4160_v53  ;;  %v4136_v59 = vadd.f32 %v4135_v54, %v4134_v48  ;;  %v4088_v60 = vmul.f32 %v9401_v2, %v9401_v2  ;;  %v4201_v21 = vrot.slane %v9398_v63, %v4200_v7 }
 0x20d   : > { %v8658_v0 = vpop.eup %8657  ;;  %v4173_v62 = vmul.f32 %v8656_v58, %v9352_v10  ;;  %v4152_v1 = vmul.f32 0.125, %v4130_v55  ;;  %v4208_v26 = vsub.s32 5, %v9376_v43  ;;  %v4205_v27 = vrot.slane %v9398_v63, %v4204_v18 }
 0x20e   : > { %v4174_v3 = vmul.f32 %v8658_v0, %v9355_v13  ;;  %v4153_v5 = vmul.f32 0.125, %v4136_v59  ;;  %v4138_v6 = vsel %vm4137_vm11, %v4088_v60, 0.0  ;;  %v4212_v31 = vsub.s32 6, %v9376_v43 }
 0x20f   : > { %v4161_v9 = vadd.f32 1e-08, %v4152_v1  ;;  %v4139_v11 = vrot.slane %v4138_v6, 4  ;;  %v4231_v12 = vmul.f32 %v4189_v56, %v4173_v62  ;;  %v4216_v39 = vsub.s32 7, %v9376_v43 }
 0x210   : > { %v8660_v15 = vpop.eup %8659  ;;  %v4162_v16 = vadd.f32 1e-08, %v4153_v5  ;;  %v4232_v17 = vmul.f32 %v4193_v61, %v4174_v3  ;;  %v4213_v37 = vrot.slane %v9398_v63, %v4212_v31 }
 0x211   : > { %v8662_v19 = vpop.eup %8661  ;;  %v4175_v10 = vmul.f32 %v8660_v15, %v9362_v20  ;;  %8667 = vrsqrt.f32 %v4161_v9  ;;  %v4140_v13 = vadd.f32 %v4139_v11, %v4138_v6  ;;  %4260 = vrot.lane.b32.xlu0 %v4231_v12, %s8767_s28  ;;  %v4217_v48 = vrot.slane %v9398_v63, %v4216_v39 }
 0x212   : > { %8669 = vrsqrt.f32 %v4162_v16  ;;  %4262 = vrot.lane.b32.xlu1 %v4232_v17, %s8767_s28  ;;  %v4176_v22 = vmul.f32 %v8662_v19, %v9364_v23  ;;  %v4209_v23 = vrot.slane %v9398_v63, %v4208_v26 }
 0x213   : > { %v4141_v24 = vrot.slane %v4140_v13, 2  ;;  %v4233_v25 = vmul.f32 %v4197_v14, %v4175_v10  ;;  %v9602_v10 = vld [vmem:[%s10141_s3 + $0x8] sm:$0xff] }
 0x214   : > { %v4234_v34 = vmul.f32 %v4201_v21, %v4176_v22 }
 0x215   : > { %v8664_v28 = vpop.eup %8663  ;;  %v4142_v20 = vadd.f32 %v4141_v24, %v4140_v13  ;;  %4264 = vrot.lane.b32.xlu0 %v4233_v25, %s8767_s28 }
 0x216   : > { %v8666_v29 = vpop.eup %8665  ;;  %v4177_v30 = vmul.f32 %v8664_v28, %v9372_v38 }
 0x217   : > { %v4178_v32 = vmul.f32 %v8666_v29, %v9374_v41  ;;  %v4143_v33 = vrot.slane %v4142_v20, 1 }
 0x218   : > { %v4235_v35 = vmul.f32 %v4205_v27, %v4177_v30 }
 0x219   : > { %v4144_v36 = vadd.f32 %v4143_v33, %v4142_v20  ;;  %4266 = vrot.lane.b32.xlu0 %v4234_v34, %s8767_s28  ;;  %v4236_v42 = vmul.f32 %v4209_v23, %v4178_v32 }
 0x21a   : > { %4268 = vrot.lane.b32.xlu1 %v4235_v35, %s8767_s28 }
 0x21b   : > { %v8668_v40 = vpop.eup %8667  ;;  %v4154_v38 = vmul.f32 0.125, %v4144_v36  ;;  %v7928_v36 = vld [vmem:[%s10142_s4] sm:$0xff] }
 0x21c   : > { %v8670_v44 = vpop.eup %8669  ;;  %v4179_v41 = vmul.f32 %v8668_v40, %v9384_v4 }
 0x21d   : > { %v4163_v45 = vadd.f32 1e-08, %v4154_v38  ;;  %4270 = vrot.lane.b32.xlu0 %v4236_v42, %s8767_s28  ;;  %v4180_v46 = vmul.f32 %v8670_v44, %v9386_v8  ;;  %v9441_v8 = vld [vmem:[#allocation2] sm:$0xff] }
 0x21e   : > { %v4237_v47 = vmul.f32 %v4213_v37, %v4179_v41  ;;  %4250 = vst.msk [vmem:[#allocation2 + $0x48] sm:$0xff] %vm4249_vm12, %v9441_v8 }
 0x21f   : > { %8671 = vrsqrt.f32 %v4163_v45  ;;  %v4238_v49 = vmul.f32 %v4217_v48, %v4180_v46 }
 0x220   : > { %4272 = vrot.lane.b32.xlu1 %v4237_v47, %s8767_s28 }
 0x224   : > { %4274 = vrot.lane.b32.xlu1 %v4238_v49, %s8767_s28 }
 0x225   : > { %v6699_v9 = vld [vmem:[#allocation2 + $0x48] sm:$0xff] }
 0x229   : > { %v8672_v43 = vpop.eup %8671 }
 0x22a   : > { %v4181_v4 = vmul.f32 %v8672_v43, %v9401_v2 }
 0x22c   : > { %v4239_v51 = vmul.f32 %v8283_v50, %v4181_v4 }
 0x22e   : > { %4276 = vrot.lane.b32.xlu0 %v4239_v51, %s8767_s28  ;;  %s10093_s28 = scalar_lea.hbm %s10144_s6, %s8596_s11 }
 0x283   : > { %v4261_v63 = vpop.permute.xlu0 %4260 }
 0x284   : > { %4297 = vst.msk [vmem:[#allocation2] sm:$0xff] %vm4296_vm13, %v4261_v63  ;;  %v4263_v52 = vpop.permute.xlu1 %4262 }
 0x285   : > { %v9445_v53 = vsel %vm4278_vm14, %v4261_v63, %v4263_v52 }
 0x287   : > { %v4265_v54 = vpop.permute.xlu0 %4264 }
 0x288   : > { %v9448_v55 = vsel %vm4278_vm14, %v4263_v52, %v4265_v54 }
 0x28b   : > { %v4267_v2 = vpop.permute.xlu0 %4266  ;;  %v9450_v56 = vld [vmem:[#allocation2] sm:$0xff] }
 0x28c   : > { %v4269_v57 = vpop.permute.xlu1 %4268  ;;  %v9453_v58 = vsel %vm4278_vm14, %v4265_v54, %v4267_v2  ;;  %5080 = vrot.lane.b32.xlu0 %v9450_v56, %s8758_s15  ;;  %4328 = vrot.lane.b32.xlu1 %v9450_v56, %s8757_s14 }
 0x28d   : > { %v9460_v59 = vsel %vm4278_vm14, %v4267_v2, %v4269_v57 }
 0x28f   : > { %v4271_v60 = vpop.permute.xlu0 %4270 }
 0x290   : > { %v9463_v61 = vsel %vm4278_vm14, %v4269_v57, %v4271_v60  ;;  %5886 = vrot.lane.b32.xlu0 %v9450_v56, %s8760_s17  ;;  %5483 = vrot.lane.b32.xlu1 %v9450_v56, %s8759_s16 }
 0x292   : > { %v4273_v0 = vpop.permute.xlu1 %4272 }
 0x293   : > { %v9470_v62 = vsel %vm4278_vm14, %v4271_v60, %v4273_v0 }
 0x294   : > { %4330 = vrot.lane.b32.xlu1 %v9445_v53, %s8757_s14  ;;  %4332 = vrot.lane.b32.xlu0 %v9448_v55, %s8757_s14 }
 0x296   : > { %v4275_v1 = vpop.permute.xlu1 %4274 }
 0x297   : > { %v9477_v3 = vsel %vm4278_vm14, %v4273_v0, %v4275_v1 }
 0x298   : > { %5082 = vrot.lane.b32.xlu0 %v9445_v53, %s8758_s15  ;;  %4334 = vrot.lane.b32.xlu1 %v9453_v58, %s8757_s14 }
 0x29c   : > { %5086 = vrot.lane.b32.xlu0 %v9453_v58, %s8758_s15  ;;  %5084 = vrot.lane.b32.xlu1 %v9448_v55, %s8758_s15 }
 0x2a0   : > { %v4277_v5 = vpop.permute.xlu0 %4276  ;;  %5487 = vrot.lane.b32.xlu0 %v9448_v55, %s8759_s16  ;;  %5485 = vrot.lane.b32.xlu1 %v9445_v53, %s8759_s16 }
 0x2a1   : > { %v4286_v6 = vsel %vm4278_vm14, %v4275_v1, %v4277_v5 }
 0x2a2   : > { %4306 = vst.msk [vmem:[#allocation2 + $0x40] sm:$0xff] %vm4305_vm15, %v4286_v6 }
 0x2a4   : > { %5489 = vrot.lane.b32.xlu0 %v9453_v58, %s8759_s16  ;;  %5890 = vrot.lane.b32.xlu1 %v9448_v55, %s8760_s17 }
 0x2a8   : > { %5888 = vrot.lane.b32.xlu0 %v9445_v53, %s8760_s17  ;;  %6291 = vrot.lane.b32.xlu1 %v9445_v53, %s8761_s18 }
 0x2a9   : > { %v9536_v7 = vld [vmem:[#allocation2 + $0x40] sm:$0xff] }
 0x2ac   : > { %5892 = vrot.lane.b32.xlu0 %v9453_v58, %s8760_s17  ;;  %5088 = vrot.lane.b32.xlu1 %v9460_v59, %s8758_s15 }
 0x2b0   : > { %6293 = vrot.lane.b32.xlu0 %v9448_v55, %s8761_s18  ;;  %5491 = vrot.lane.b32.xlu1 %v9460_v59, %s8759_s16 }
 0x2b4   : > { %4336 = vrot.lane.b32.xlu0 %v9460_v59, %s8757_s14  ;;  %5894 = vrot.lane.b32.xlu1 %v9460_v59, %s8760_s17 }
 0x2b8   : > { %4340 = vrot.lane.b32.xlu1 %v9470_v62, %s8757_s14  ;;  %4338 = vrot.lane.b32.xlu0 %v9463_v61, %s8757_s14 }
 0x2bc   : > { %5090 = vrot.lane.b32.xlu1 %v9463_v61, %s8758_s15  ;;  %4342 = vrot.lane.b32.xlu0 %v9477_v3, %s8757_s14 }
 0x2c0   : > { %5094 = vrot.lane.b32.xlu1 %v9477_v3, %s8758_s15  ;;  %5092 = vrot.lane.b32.xlu0 %v9470_v62, %s8758_s15 }
 0x2c4   : > { %5495 = vrot.lane.b32.xlu1 %v9470_v62, %s8759_s16  ;;  %5493 = vrot.lane.b32.xlu0 %v9463_v61, %s8759_s16 }
 0x2c8   : > { %5896 = vrot.lane.b32.xlu1 %v9463_v61, %s8760_s17  ;;  %5497 = vrot.lane.b32.xlu0 %v9477_v3, %s8759_s16 }
 0x2cc   : > { %5900 = vrot.lane.b32.xlu1 %v9477_v3, %s8760_s17  ;;  %5898 = vrot.lane.b32.xlu0 %v9470_v62, %s8760_s17 }
 0x2d0   : > { %6295 = vrot.lane.b32.xlu0 %v9453_v58, %s8761_s18  ;;  %4344 = vrot.lane.b32.xlu1 %v9536_v7, %s8757_s14  ;;  %s8696_s14 = sshll.u32 %s8768_s25, 4  ;;  %s8697_s14 = int_to_ptr.vmem [resolvable:$false] %s8696_s14 }
 0x2d4   : > { %6299 = vrot.lane.b32.xlu0 %v9463_v61, %s8761_s18  ;;  %6289 = vrot.lane.b32.xlu1 %v9450_v56, %s8761_s18 }
 0x2d8   : > { %6303 = vrot.lane.b32.xlu0 %v9477_v3, %s8761_s18  ;;  %6297 = vrot.lane.b32.xlu1 %v9460_v59, %s8761_s18 }
 0x2dc   : > { %6714 = vrot.lane.b32.xlu0 %v9445_v53, %s8762_s19  ;;  %6301 = vrot.lane.b32.xlu1 %v9470_v62, %s8761_s18 }
 0x2e0   : > { %5096 = vrot.lane.b32.xlu0 %v9536_v7, %s8758_s15  ;;  %6716 = vrot.lane.b32.xlu1 %v9448_v55, %s8762_s19  ;;  %s8698_s15 = scalar_lea.vmem %s8697_s14, 2304 }
 0x2e4   : > { %6712 = vrot.lane.b32.xlu0 %v9450_v56, %s8762_s19  ;;  %6722 = vrot.lane.b32.xlu1 %v9463_v61, %s8762_s19 }
 0x2e8   : > { %6724 = vrot.lane.b32.xlu0 %v9470_v62, %s8762_s19  ;;  %6720 = vrot.lane.b32.xlu1 %v9460_v59, %s8762_s19 }
 0x2ec   : > { %6718 = vrot.lane.b32.xlu0 %v9453_v58, %s8762_s19  ;;  %5499 = vrot.lane.b32.xlu1 %v9536_v7, %s8759_s16 }
 0x2f0   : > { %6730 = vrot.lane.b32.xlu0 %v6699_v9, %s8762_s19  ;;  %6726 = vrot.lane.b32.xlu1 %v9477_v3, %s8762_s19 }
 0x2f4   : > { %5902 = vrot.lane.b32.xlu0 %v9536_v7, %s8760_s17  ;;  %7122 = vrot.lane.b32.xlu1 %v9448_v55, %s8763_s20 }
 0x2f8   : > { %7120 = vrot.lane.b32.xlu0 %v9445_v53, %s8763_s20  ;;  %7124 = vrot.lane.b32.xlu1 %v9453_v58, %s8763_s20 }
 0x2fc   : > { %7118 = vrot.lane.b32.xlu0 %v9450_v56, %s8763_s20  ;;  %7128 = vrot.lane.b32.xlu1 %v9463_v61, %s8763_s20 }
 0x2fe   : > { %v4329_v11 = vpop.permute.xlu1 %4328  ;;  %v5081_v12 = vpop.permute.xlu0 %5080 }
 0x300   : > { %7126 = vrot.lane.b32.xlu0 %v9460_v59, %s8763_s20  ;;  %6305 = vrot.lane.b32.xlu1 %v9536_v7, %s8761_s18 }
 0x302   : > { %v5484_v14 = vpop.permute.xlu1 %5483  ;;  %v5887_v15 = vpop.permute.xlu0 %5886 }
 0x304   : > { %7130 = vrot.lane.b32.xlu0 %v9470_v62, %s8763_s20  ;;  %7132 = vrot.lane.b32.xlu1 %v9477_v3, %s8763_s20 }
 0x306   : > { %v4331_v16 = vpop.permute.xlu1 %4330  ;;  %v4333_v17 = vpop.permute.xlu0 %4332 }
 0x307   : > { %v4346_v18 = vsel %vm285_vm0, %v4329_v11, %v4331_v16  ;;  %v4347_v19 = vsel %vm285_vm0, %v4331_v16, %v4333_v17 }
 0x308   : > { %7528 = vrot.lane.b32.xlu0 %v9448_v55, %s8764_s29  ;;  %6728 = vrot.lane.b32.xlu1 %v9536_v7, %s8762_s19  ;;  %s242_s19 = sand.u32 1, %s8746_s22  }
 0x309   : > { %4367 = vmatprep.subr.mxu1 %v4347_v19  ;;  %s8071_s9 = scalar_lea.sflag [#allocation4], %s242_s19 }
 0x30a   : > { %4368 = vmatpush1.msra.mxu1 %v4346_v18  ;;  %v4335_v13 = vpop.permute.xlu1 %4334  ;;  %v9604_v21 = vpop.permute.xlu0 %5082 }
 0x30b   : > { %v9608_v22 = vsel %vm1080_vm4, %v5081_v12, %v9604_v21  ;;  %8285 = vmatmul.mubr.msk.f32.vlgmr.msra.gmra.mrb[12].mxu1 %vm4363_vm1, %v9602_v10  ;;  %v4348_v47 = vsel %vm285_vm0, %v4333_v17, %v4335_v13 }
 0x30c   : > { %7136 = vrot.lane.b32.xlu0 %v6699_v9, %s8763_s20  ;;  %7526 = vrot.lane.b32.xlu1 %v9445_v53, %s8764_s29 }
 0x30d   : > { %4573 = vmatprep.mubr.f32.mxu1 %v9441_v8 }
 0x30e   : > { %v9616_v24 = vpop.permute.xlu1 %5084  ;;  %v9618_v25 = vpop.permute.xlu0 %5086 }
 0x30f   : > { %v9623_v26 = vsel %vm1080_vm4, %v9616_v24, %v9618_v25 }
 0x310   : > { %7134 = vrot.lane.b32.xlu0 %v9536_v7, %s8763_s20  ;;  %7524 = vrot.lane.b32.xlu1 %v9450_v56, %s8764_s29  ;;  %s8594_s20 = smul.u32 72, %s242_s19 }
 0x312   : > { %v5486_v27 = vpop.permute.xlu1 %5485  ;;  %v5488_v28 = vpop.permute.xlu0 %5487 }
 0x313   : > { %v9630_v20 = vsel %vm1507_vm5, %v5484_v14, %v5486_v27  ;;  %v9633_v29 = vsel %vm1507_vm5, %v5486_v27, %v5488_v28 }
 0x314   : > { %7536 = vrot.lane.b32.xlu0 %v9470_v62, %s8764_s29  ;;  %7534 = vrot.lane.b32.xlu1 %v9463_v61, %s8764_s29 }
 0x316   : > { %v5891_v30 = vpop.permute.xlu1 %5890  ;;  %v9639_v31 = vpop.permute.xlu0 %5489 }
 0x317   : > { %v9643_v32 = vsel %vm1507_vm5, %v5488_v28, %v9639_v31 }
 0x318   : > { %7530 = vrot.lane.b32.xlu0 %v9453_v58, %s8764_s29  ;;  %7532 = vrot.lane.b32.xlu1 %v9460_v59, %s8764_s29 }
 0x31a   : > { %v9649_v33 = vpop.permute.xlu1 %6291  ;;  %v5889_v34 = vpop.permute.xlu0 %5888 }
 0x31b   : > { %v9652_v23 = vsel %vm1934_vm6, %v5887_v15, %v5889_v34  ;;  %v9655_v35 = vsel %vm1934_vm6, %v5889_v34, %v5891_v30  ;;  %v4316_v15 = vld [vmem:[%s10141_s3] sm:$0xff] }
 0x31c   : > { %7542 = vrot.lane.b32.xlu0 %v6699_v9, %s8764_s29  ;;  %7540 = vrot.lane.b32.xlu1 %v9536_v7, %s8764_s29 }
 0x31e   : > { %v9663_v37 = vpop.permute.xlu1 %5088  ;;  %v9665_v39 = vpop.permute.xlu0 %5892 }
 0x31f   : > { %v9669_v40 = vsel %vm1934_vm6, %v5891_v30, %v9665_v39 }
 0x320   : > { %7538 = vrot.lane.b32.xlu1 %v9477_v3, %s8764_s29  ;;  %7931 = vperm.xlu0 %8649, %v7928_v36   ;;  %s10071_s29 = scalar_lea.vmem [#allocation3], %s8594_s20 }
 0x321   : > { %s8085_s12 = sshll.u32 %s10071_s29, 4  ;;  %s10095_s12 = int_to_ptr.vmem [resolvable:$true] %s8085_s12 }
 0x322   : > { %v9673_v38 = vpop.permute.xlu1 %5491  ;;  %v9675_v42 = vpop.permute.xlu0 %6293  ;;  %s8692_s10 = scalar_lea.vmem %s10095_s12, 1152  ;;  %p8699_p0 = scmp.lt.s32.totalorder %s10095_s12, %s8697_s14 }
 0x323   : > { %v9680_v44 = vsel %vm2361_vm7, %v9649_v33, %v9675_v42  ;;  %p8693_p11 = scmp.ne.s32.totalorder %s10095_s12, %s8692_s10  ;;  %p8700_p1 = scmp.lt.s32.totalorder %s8698_s15, %s8692_s10 }
 0x325   : > { %p8694_p12 = pnand %p8693_p11, %p8842_p5  ;;  %p8701_p2 = por %p8700_p1, %p8699_p0 }
 0x326   : > { %v9682_v41 = vpop.permute.xlu1 %5894  ;;  %v4337_v45 = vpop.permute.xlu0 %4336 }
 0x327   : > { %v4349_v46 = vsel %vm285_vm0, %v4335_v13, %v4337_v45  ;;  %p8695_p13 = pneg %p8694_p12 }
 0x328   : > { %4438 = vmatprep.subr.mxu0 %v4349_v46 }
 0x329   : > { %4439 = vmatpush1.msra.mxu0 %v4348_v47  ;;  %p8702_p3 = pnand %p8701_p2, %p8695_p13 }
 0x32a   : > { %v4341_v48 = vpop.permute.xlu1 %4340  ;;  %v4339_v49 = vpop.permute.xlu0 %4338  ;;  %8286 = vmatmul.mubr.msk.f32.vlgmr.msra.gmra.mrb[14].mxu0 %vm4363_vm1, %v9602_v10 }
 0x32b   : > { %v4350_v43 = vsel %vm285_vm0, %v4337_v45, %v4339_v49  ;;  %v4351_v50 = vsel %vm285_vm0, %v4339_v49, %v4341_v48  ;;  %4644 = vmatprep.mubr.f32.mxu0 %v9441_v8 }
 0x32c   : > { %4509 = vmatprep.subr.mxu1 %v4351_v50 }
 0x32d   : > { %4510 = vmatpush1.msra.mxu1 %v4350_v43  ;;  %v8313_v43 = vld [vmem:[%s10141_s3 + $0x28] sm:$0xff] }
 0x32e   : > { %v5091_v4 = vpop.permute.xlu1 %5090  ;;  %v4343_v51 = vpop.permute.xlu0 %4342  ;;  %8287 = vmatmul.mubr.msk.f32.vlgmr.msra.gmra.mrb[14].mxu1 %vm4363_vm1, %v9602_v10  ;;  %8421 = vmatprep.subr.mxu1 %v9441_v8 }
 0x32f   : > { %8423 = vmatprep.mubr.msk.f32.mxu1 %vm8765_vm3, %v9441_v8  ;;  %v4352_v11 = vsel %vm285_vm0, %v4341_v48, %v4343_v51  ;;  %v5102_v16 = vsel %vm1080_vm4, %v9663_v37, %v5091_v4 }
 0x332   : > { %v9696_v63 = vpop.permute.xlu1 %5094  ;;  %v9698_v52 = vpop.permute.xlu0 %5092 }
 0x333   : > { %v5104_v13 = vsel %vm1080_vm4, %v9698_v52, %v9696_v63 }
 0x336   : > { %v9700_v54 = vpop.permute.xlu1 %5495  ;;  %v9702_v2 = vpop.permute.xlu0 %5493 }
 0x337   : > { %v5505_v27 = vsel %vm1507_vm5, %v9673_v38, %v9702_v2 }
 0x33a   : > { %v9704_v57 = vpop.permute.xlu1 %5896  ;;  %v9706_v60 = vpop.permute.xlu0 %5497 }
 0x33b   : > { %v5507_v30 = vsel %vm1507_vm5, %v9700_v54, %v9706_v60  ;;  %v5908_v36 = vsel %vm1934_vm6, %v9682_v41, %v9704_v57 }
 0x33e   : > { %v9708_v0 = vpop.permute.xlu1 %5900  ;;  %v9710_v1 = vpop.permute.xlu0 %5898 }
 0x33f   : > { %v5910_v46 = vsel %vm1934_vm6, %v9710_v1, %v9708_v0 }
 0x342   : > { %v4345_v5 = vpop.permute.xlu1 %4344  ;;  %v9712_v6 = vpop.permute.xlu0 %6295 }
 0x343   : > { %8422 = vmatpush3.msra.mxu1 %v4345_v5  ;;  %v4353_v9 = vsel %vm285_vm0, %v4343_v51, %v4345_v5 }
 0x344   : > { %4580 = vmatprep.subr.mxu0 %v4353_v9  ;;  %8424 = vmatmul.mubr.msk.f32.vlgmr.msra.gmra.mrb[16].mxu1 %vm4363_vm1, %v9602_v10 }
 0x345   : > { %4724 = vmatprep.subr.mxu1 %v9445_v53  ;;  %4581 = vmatpush1.msra.mxu0 %v4352_v11  ;;  %v5099_v53 = vsel %vm1080_vm4, %v9604_v21, %v9616_v24  ;;  %v5504_v21 = vsel %vm1507_vm5, %v9639_v31, %v9673_v38  ;;  %v5909_v31 = vsel %vm1934_vm6, %v9704_v57, %v9710_v1 }
 0x346   : > { %4725 = vmatpush1.msra.mxu1 %v9450_v56  ;;  %v9720_v12 = vpop.permute.xlu1 %6289  ;;  %8288 = vmatmul.mubr.msk.f32.vlgmr.msra.gmra.mrb[16].mxu0 %vm4363_vm1, %v9602_v10  ;;  %v9724_v14 = vpop.permute.xlu0 %6299 }
 0x347   : > { %4795 = vmatprep.subr.mxu0 %v9453_v58  ;;  %4866 = vmatprep.subr.mxu1 %v9463_v61  ;;  %v6307_v47 = vsel %vm2361_vm7, %v9720_v12, %v9649_v33  ;;  %v6309_v33 = vsel %vm2361_vm7, %v9675_v42, %v9712_v6 }
 0x348   : > { %4788 = vmatprep.mubr.f32.mxu1 %v9441_v8  ;;  %4796 = vmatpush1.msra.mxu0 %v9448_v55  ;;  %v5103_v55 = vsel %vm1080_vm4, %v5091_v4, %v9698_v52 }
 0x349   : > { %8290 = vmatmul.mubr.msk.f32.vlgmr.msra.gmra.mrb[12].mxu1 %vm4363_vm1, %v4316_v15  ;;  %4937 = vmatprep.subr.mxu0 %v9477_v3  ;;  %v5101_v3 = vsel %vm1080_vm4, %v9618_v25, %v9663_v37 }
 0x34a   : > { %4867 = vmatpush1.msra.mxu1 %v9460_v59  ;;  %4859 = vmatprep.mubr.f32.mxu0 %v9441_v8  ;;  %v9740_v56 = vpop.permute.xlu1 %6297  ;;  %v9742_v58 = vpop.permute.xlu0 %6303 }
 0x34b   : > { %5118 = vmatprep.subr.mxu1 %v5099_v53  ;;  %8291 = vmatmul.mubr.msk.f32.vlgmr.msra.gmra.mrb[14].mxu0 %vm4363_vm1, %v4316_v15  ;;  %v6311_v50 = vsel %vm2361_vm7, %v9740_v56, %v9724_v14 }
 0x34c   : > { %4938 = vmatpush1.msra.mxu0 %v9470_v62  ;;  %4930 = vmatprep.mubr.f32.mxu1 %v9441_v8  ;;  %v8295_v62 = vld [vmem:[%s10141_s3 + $0x10] sm:$0xff] }
 0x34d   : > { %8292 = vmatmul.mubr.msk.f32.vlgmr.msra.gmra.mrb[14].mxu1 %vm4363_vm1, %v4316_v15  ;;  %5001 = vmatprep.mubr.f32.mxu0 %v9441_v8 }
 0x34e   : > { %5119 = vmatpush1.msra.mxu1 %v9608_v22  ;;  %8426 = vmatprep.subr.mxu0 %v9441_v8  ;;  %v9753_v59 = vpop.permute.xlu1 %6301  ;;  %v9755_v61 = vpop.permute.xlu0 %6714  ;;  %v5506_v22 = vsel %vm1507_vm5, %v9702_v2, %v9700_v54 }
 0x34f   : > { %5260 = vmatprep.subr.mxu1 %v5103_v55  ;;  %8293 = vmatmul.mubr.msk.f32.vlgmr.msra.gmra.mrb[16].mxu0 %vm4363_vm1, %v4316_v15  ;;  %v6313_v52 = vsel %vm2361_vm7, %v9753_v59, %v9742_v58 }
 0x350   : > { %8427 = vmatpush3.msra.mxu0 %v9536_v7  ;;  %5182 = vmatprep.mubr.f32.mxu1 %v9441_v8 }
 0x351   : > { %5189 = vmatprep.subr.mxu0 %v5101_v3  ;;  %8296 = vmatmul.mubr.msk.f32.vlgmr.msra.gmra.mrb[12].mxu1 %vm4363_vm1, %v8295_v62 }
 0x352   : > { %5261 = vmatpush1.msra.mxu1 %v5102_v16  ;;  %8428 = vmatprep.mubr.msk.f32.mxu0 %vm8765_vm3, %v9441_v8  ;;  %v9771_v17 = vpop.permute.xlu1 %6716  ;;  %v5097_v18 = vpop.permute.xlu0 %5096  ;;  %v8325_v16 = vld [vmem:[%s10141_s3 + $0x38] sm:$0xff] }
 0x353   : > { %8429 = vmatmul.mubr.msk.f32.vlgmr.msra.gmra.mrb[18].mxu0 %vm4363_vm1, %v4316_v15  ;;  %5324 = vmatprep.mubr.f32.mxu1 %v9441_v8  ;;  %v5105_v7 = vsel %vm1080_vm4, %v9696_v63, %v5097_v18  ;;  %v6733_v4 = vsel %vm2791_vm8, %v9755_v61, %v9771_v17 }
 0x354   : > { %5190 = vmatpush1.msra.mxu0 %v9623_v26  ;;  %8431 = vmatprep.subr.mxu1 %v9441_v8  ;;  %v8301_v26 = vld [vmem:[%s10141_s3 + $0x18] sm:$0xff] }
 0x355   : > { %8298 = vmatmul.mubr.msk.f32.vlgmr.msra.gmra.mrb[14].mxu1 %vm4363_vm1, %v8295_v62  ;;  %5331 = vmatprep.subr.mxu0 %v5105_v7 }
 0x356   : > { %8432 = vmatpush3.msra.mxu1 %v5097_v18  ;;  %5253 = vmatprep.mubr.f32.mxu0 %v9441_v8  ;;  %v9781_v19 = vpop.permute.xlu1 %6722  ;;  %v9783_v10 = vpop.permute.xlu0 %6712 }
 0x357   : > { %5521 = vmatprep.subr.mxu1 %v9633_v29  ;;  %8297 = vmatmul.mubr.msk.f32.vlgmr.msra.gmra.mrb[14].mxu0 %vm4363_vm1, %v8295_v62  ;;  %v6732_v54 = vsel %vm2791_vm8, %v9783_v10, %v9755_v61 }
 0x358   : > { %5332 = vmatpush1.msra.mxu0 %v5104_v13  ;;  %8433 = vmatprep.mubr.msk.f32.mxu1 %vm8765_vm3, %v9441_v8 }
 0x359   : > { %5592 = vmatprep.subr.mxu0 %v5504_v21  ;;  %8434 = vmatmul.mubr.msk.f32.vlgmr.msra.gmra.mrb[18].mxu1 %vm4363_vm1, %v8295_v62 }
 0x35a   : > { %5522 = vmatpush1.msra.mxu1 %v9630_v20  ;;  %5395 = vmatprep.mubr.f32.mxu0 %v9441_v8  ;;  %v9801_v24 = vpop.permute.xlu1 %6720  ;;  %v9803_v25 = vpop.permute.xlu0 %6724 }
 0x35b   : > { %5663 = vmatprep.subr.mxu1 %v5506_v22  ;;  %8299 = vmatmul.mubr.msk.f32.vlgmr.msra.gmra.mrb[16].mxu0 %vm4363_vm1, %v8295_v62  ;;  %v6737_v2 = vsel %vm2791_vm8, %v9781_v19, %v9803_v25  ;;  %v6736_v5 = vsel %vm2791_vm8, %v9801_v24, %v9781_v19 }
 0x35c   : > { %5593 = vmatpush1.msra.mxu0 %v9643_v32  ;;  %5585 = vmatprep.mubr.f32.mxu1 %v9441_v8 }
 0x35d   : > { %8302 = vmatmul.mubr.msk.f32.vlgmr.msra.gmra.mrb[12].mxu1 %vm4363_vm1, %v8301_v26  ;;  %5656 = vmatprep.mubr.f32.mxu0 %v9441_v8 }
 0x35e   : > { %5664 = vmatpush1.msra.mxu1 %v5505_v27  ;;  %v5500_v28 = vpop.permute.xlu1 %5499  ;;  %v9816_v20 = vpop.permute.xlu0 %6718  ;;  %5727 = vmatprep.mubr.f32.mxu1 %v9441_v8  ;;  %v8331_v27 = vld [vmem:[%s10141_s3 + $0x40] sm:$0xff] }
 0x35f   : > { %5924 = vmatprep.subr.mxu1 %v9655_v35  ;;  %8303 = vmatmul.mubr.msk.f32.vlgmr.msra.gmra.mrb[14].mxu0 %vm4363_vm1, %v8301_v26  ;;  %v5508_v29 = vsel %vm1507_vm5, %v9706_v60, %v5500_v28  ;;  %v8307_v35 = vld [vmem:[%s10141_s3 + $0x20] sm:$0xff]  ;;  %v6735_v1 = vsel %vm2791_vm8, %v9816_v20, %v9801_v24  ;;  %v6734_v11 = vsel %vm2791_vm8, %v9771_v17, %v9816_v20 }
 0x360   : > { %5734 = vmatprep.subr.mxu0 %v5508_v29  ;;  %5798 = vmatprep.mubr.f32.mxu0 %v9441_v8 }
 0x361   : > { %8304 = vmatmul.mubr.msk.f32.vlgmr.msra.gmra.mrb[14].mxu1 %vm4363_vm1, %v8301_v26  ;;  %5735 = vmatpush1.msra.mxu0 %v5507_v30 }
 0x362   : > { %5925 = vmatpush1.msra.mxu1 %v9652_v23  ;;  %v9832_v32 = vpop.permute.xlu1 %6726  ;;  %8436 = vmatprep.subr.mxu0 %v9441_v8  ;;  %v9835_v34 = vpop.permute.xlu0 %6730  ;;  %v5907_v23 = vsel %vm1934_vm6, %v9665_v39, %v9682_v41 }
 0x363   : > { %6066 = vmatprep.subr.mxu1 %v5909_v31  ;;  %8305 = vmatmul.mubr.msk.f32.vlgmr.msra.gmra.mrb[16].mxu0 %vm4363_vm1, %v8301_v26 }
 0x364   : > { %8437 = vmatpush3.msra.mxu0 %v5500_v28  ;;  %5988 = vmatprep.mubr.f32.mxu1 %v9441_v8 }
 0x365   : > { %8308 = vmatmul.mubr.msk.f32.vlgmr.msra.gmra.mrb[12].mxu1 %vm4363_vm1, %v8307_v35  ;;  %5995 = vmatprep.subr.mxu0 %v5907_v23 }
 0x366   : > { %6067 = vmatpush1.msra.mxu1 %v5908_v36  ;;  %8438 = vmatprep.mubr.msk.f32.mxu0 %vm8765_vm3, %v9441_v8  ;;  %v9851_v37 = vpop.permute.xlu1 %7122  ;;  %v5903_v38 = vpop.permute.xlu0 %5902 }
 0x367   : > { %8439 = vmatmul.mubr.msk.f32.vlgmr.msra.gmra.mrb[20].mxu0 %vm4363_vm1, %v8301_v26  ;;  %6130 = vmatprep.mubr.f32.mxu1 %v9441_v8  ;;  %v5911_v39 = vsel %vm1934_vm6, %v9708_v0, %v5903_v38  ;;  %v8319_v0 = vld [vmem:[%s10141_s3 + $0x30] sm:$0xff] }
 0x368   : > { %5996 = vmatpush1.msra.mxu0 %v9669_v40  ;;  %8441 = vmatprep.subr.mxu1 %v9441_v8  ;;  %v6310_v40 = vsel %vm2361_vm7, %v9712_v6, %v9740_v56 }
 0x369   : > { %8310 = vmatmul.mubr.msk.f32.vlgmr.msra.gmra.mrb[14].mxu1 %vm4363_vm1, %v8307_v35  ;;  %6137 = vmatprep.subr.mxu0 %v5911_v39 }
 0x36a   : > { %8442 = vmatpush3.msra.mxu1 %v5903_v38  ;;  %6059 = vmatprep.mubr.f32.mxu0 %v9441_v8  ;;  %v9861_v41 = vpop.permute.xlu1 %7124  ;;  %v9863_v45 = vpop.permute.xlu0 %7120 }
 0x36b   : > { %6327 = vmatprep.subr.mxu1 %v9680_v44  ;;  %8309 = vmatmul.mubr.msk.f32.vlgmr.msra.gmra.mrb[14].mxu0 %vm4363_vm1, %v8307_v35  ;;  %v6312_v44 = vsel %vm2361_vm7, %v9724_v14, %v9753_v59  ;;  %v7139_v15 = vsel %vm3222_vm9, %v9863_v45, %v9851_v37  ;;  %v7140_v17 = vsel %vm3222_vm9, %v9851_v37, %v9861_v41 }
 0x36c   : > { %6138 = vmatpush1.msra.mxu0 %v5910_v46  ;;  %8443 = vmatprep.mubr.msk.f32.mxu1 %vm8765_vm3, %v9441_v8 }
 0x36d   : > { %6398 = vmatprep.subr.mxu0 %v6310_v40  ;;  %8444 = vmatmul.mubr.msk.f32.vlgmr.msra.gmra.mrb[20].mxu1 %vm4363_vm1, %v8307_v35 }
 0x36e   : > { %6328 = vmatpush1.msra.mxu1 %v6307_v47  ;;  %6201 = vmatprep.mubr.f32.mxu0 %v9441_v8  ;;  %v9883_v48 = vpop.permute.xlu1 %7128  ;;  %v9885_v49 = vpop.permute.xlu0 %7118 }
 0x36f   : > { %6469 = vmatprep.subr.mxu1 %v6312_v44  ;;  %8311 = vmatmul.mubr.msk.f32.vlgmr.msra.gmra.mrb[16].mxu0 %vm4363_vm1, %v8307_v35  ;;  %v7138_v59 = vsel %vm3222_vm9, %v9885_v49, %v9863_v45 }
 0x370   : > { %6399 = vmatpush1.msra.mxu0 %v6309_v33  ;;  %6391 = vmatprep.mubr.f32.mxu1 %v9441_v8 }
 0x371   : > { %8314 = vmatmul.mubr.msk.f32.vlgmr.msra.gmra.mrb[12].mxu1 %vm4363_vm1, %v8313_v43  ;;  %6462 = vmatprep.mubr.f32.mxu0 %v9441_v8 }
 0x372   : > { %6470 = vmatpush1.msra.mxu1 %v6311_v50  ;;  %v6306_v42 = vpop.permute.xlu1 %6305  ;;  %v9903_v51 = vpop.permute.xlu0 %7126  ;;  %6533 = vmatprep.mubr.f32.mxu1 %v9441_v8 }
 0x373   : > { %6753 = vmatprep.subr.mxu1 %v6733_v4  ;;  %8315 = vmatmul.mubr.msk.f32.vlgmr.msra.gmra.mrb[14].mxu0 %vm4363_vm1, %v8313_v43  ;;  %v6314_v63 = vsel %vm2361_vm7, %v9742_v58, %v6306_v42  ;;  %v6738_v58 = vsel %vm2791_vm8, %v9803_v25, %v9832_v32  ;;  %v7141_v55 = vsel %vm3222_vm9, %v9861_v41, %v9903_v51 }
 0x374   : > { %6540 = vmatprep.subr.mxu0 %v6314_v63  ;;  %6604 = vmatprep.mubr.f32.mxu0 %v9441_v8  ;;  %v7142_v7 = vsel %vm3222_vm9, %v9903_v51, %v9883_v48 }
 0x375   : > { %8316 = vmatmul.mubr.msk.f32.vlgmr.msra.gmra.mrb[14].mxu1 %vm4363_vm1, %v8313_v43  ;;  %6541 = vmatpush1.msra.mxu0 %v6313_v52 }
 0x376   : > { %6754 = vmatpush1.msra.mxu1 %v6732_v54  ;;  %v7133_v57 = vpop.permute.xlu1 %7132  ;;  %8446 = vmatprep.subr.mxu0 %v9441_v8  ;;  %v7131_v60 = vpop.permute.xlu0 %7130 }
 0x377   : > { %6895 = vmatprep.subr.mxu1 %v6737_v2  ;;  %8317 = vmatmul.mubr.msk.f32.vlgmr.msra.gmra.mrb[16].mxu0 %vm4363_vm1, %v8313_v43  ;;  %v7143_v61 = vsel %vm3222_vm9, %v9883_v48, %v7131_v60  ;;  %v7144_v21 = vsel %vm3222_vm9, %v7131_v60, %v7133_v57 }
 0x378   : > { %8447 = vmatpush3.msra.mxu0 %v6306_v42  ;;  %6817 = vmatprep.mubr.f32.mxu1 %v9441_v8 }
 0x379   : > { %8320 = vmatmul.mubr.msk.f32.vlgmr.msra.gmra.mrb[12].mxu1 %vm4363_vm1, %v8319_v0  ;;  %6824 = vmatprep.subr.mxu0 %v6735_v1 }
 0x37a   : > { %6896 = vmatpush1.msra.mxu1 %v6736_v5  ;;  %8448 = vmatprep.mubr.msk.f32.mxu0 %vm8765_vm3, %v9441_v8  ;;  %v6729_v6 = vpop.permute.xlu1 %6728  ;;  %v9935_v9 = vpop.permute.xlu0 %7528 }
 0x37b   : > { %v6740_v12 = vsel %vm2791_vm8, %v6729_v6, %v9835_v34  ;;  %8449 = vmatmul.mubr.msk.f32.vlgmr.msra.gmra.mrb[22].mxu0 %vm4363_vm1, %v8313_v43  ;;  %6959 = vmatprep.mubr.f32.mxu1 %v9441_v8  ;;  %v6739_v14 = vsel %vm2791_vm8, %v9832_v32, %v6729_v6 }
 0x37c   : > { %6825 = vmatpush1.msra.mxu0 %v6734_v11  ;;  %8451 = vmatprep.subr.mxu1 %v9441_v8 }
 0x37d   : > { %8322 = vmatmul.mubr.msk.f32.vlgmr.msra.gmra.mrb[14].mxu1 %vm4363_vm1, %v8319_v0  ;;  %6966 = vmatprep.subr.mxu0 %v6739_v14 }
 0x37e   : > { %8452 = vmatpush3.msra.mxu1 %v6740_v12  ;;  %6888 = vmatprep.mubr.f32.mxu0 %v9441_v8  ;;  %v7527_v53 = vpop.permute.xlu1 %7526  ;;  %v7137_v56 = vpop.permute.xlu0 %7136 }
 0x37f   : > { %7159 = vmatprep.subr.mxu1 %v7139_v15  ;;  %8321 = vmatmul.mubr.msk.f32.vlgmr.msra.gmra.mrb[14].mxu0 %vm4363_vm1, %v8319_v0  ;;  %v7545_v19 = vsel %vm3653_vm10, %v7527_v53, %v9935_v9 }
 0x380   : > { %6967 = vmatpush1.msra.mxu0 %v6738_v58  ;;  %8453 = vmatprep.mubr.msk.f32.mxu1 %vm8765_vm3, %v9441_v8 }
 0x381   : > { %7230 = vmatprep.subr.mxu0 %v7141_v55  ;;  %8454 = vmatmul.mubr.msk.f32.vlgmr.msra.gmra.mrb[22].mxu1 %vm4363_vm1, %v8319_v0 }
 0x382   : > { %7160 = vmatpush1.msra.mxu1 %v7138_v59  ;;  %7030 = vmatprep.mubr.f32.mxu0 %v9441_v8  ;;  %v7525_v62 = vpop.permute.xlu1 %7524  ;;  %v7135_v3 = vpop.permute.xlu0 %7134 }
 0x383   : > { %7301 = vmatprep.subr.mxu1 %v7143_v61  ;;  %8323 = vmatmul.mubr.msk.f32.vlgmr.msra.gmra.mrb[16].mxu0 %vm4363_vm1, %v8319_v0  ;;  %v7145_v18 = vsel %vm3222_vm9, %v7133_v57, %v7135_v3  ;;  %v7544_v24 = vsel %vm3653_vm10, %v7525_v62, %v7527_v53  ;;  %v7146_v28 = vsel %vm3222_vm9, %v7135_v3, %v7137_v56 }
 0x384   : > { %7231 = vmatpush1.msra.mxu0 %v7140_v17  ;;  %7223 = vmatprep.mubr.f32.mxu1 %v9441_v8 }
 0x385   : > { %8326 = vmatmul.mubr.msk.f32.vlgmr.msra.gmra.mrb[12].mxu1 %vm4363_vm1, %v8325_v16  ;;  %7372 = vmatprep.subr.mxu0 %v7145_v18 }
 0x386   : > { %7302 = vmatpush1.msra.mxu1 %v7142_v7  ;;  %7294 = vmatprep.mubr.f32.mxu0 %v9441_v8  ;;  %v7535_v10 = vpop.permute.xlu1 %7534  ;;  %v7537_v13 = vpop.permute.xlu0 %7536 }
 0x387   : > { %7565 = vmatprep.subr.mxu1 %v7545_v19  ;;  %8327 = vmatmul.mubr.msk.f32.vlgmr.msra.gmra.mrb[14].mxu0 %vm4363_vm1, %v8325_v16  ;;  %v7549_v22 = vsel %vm3653_vm10, %v7535_v10, %v7537_v13 }
 0x388   : > { %7373 = vmatpush1.msra.mxu0 %v7144_v21  ;;  %7365 = vmatprep.mubr.f32.mxu1 %v9441_v8 }
 0x389   : > { %8328 = vmatmul.mubr.msk.f32.vlgmr.msra.gmra.mrb[14].mxu1 %vm4363_vm1, %v8325_v16  ;;  %7436 = vmatprep.mubr.f32.mxu0 %v9441_v8 }
 0x38a   : > { %7566 = vmatpush1.msra.mxu1 %v7544_v24  ;;  %8456 = vmatprep.subr.mxu0 %v9441_v8  ;;  %v7533_v25 = vpop.permute.xlu1 %7532  ;;  %v7531_v26 = vpop.permute.xlu0 %7530 }
 0x38b   : > { %7707 = vmatprep.subr.mxu1 %v7549_v22  ;;  %v7548_v20 = vsel %vm3653_vm10, %v7533_v25, %v7535_v10  ;;  %8329 = vmatmul.mubr.msk.f32.vlgmr.msra.gmra.mrb[16].mxu0 %vm4363_vm1, %v8325_v16  ;;  %v7547_v29 = vsel %vm3653_vm10, %v7531_v26, %v7533_v25  ;;  %v7546_v32 = vsel %vm3653_vm10, %v9935_v9, %v7531_v26 }
 0x38c   : > { %8457 = vmatpush3.msra.mxu0 %v7146_v28  ;;  %7629 = vmatprep.mubr.f32.mxu1 %v9441_v8 }
 0x38d   : > { %8332 = vmatmul.mubr.msk.f32.vlgmr.msra.gmra.mrb[12].mxu1 %vm4363_vm1, %v8331_v27  ;;  %7636 = vmatprep.subr.mxu0 %v7547_v29 }
 0x38e   : > { %7708 = vmatpush1.msra.mxu1 %v7548_v20  ;;  %8458 = vmatprep.mubr.msk.f32.mxu0 %vm8765_vm3, %v9441_v8  ;;  %v7541_v30 = vpop.permute.xlu1 %7540  ;;  %v7543_v31 = vpop.permute.xlu0 %7542 }
 0x38f   : > { %8459 = vmatmul.mubr.msk.f32.vlgmr.msra.gmra.mrb[24].mxu0 %vm4363_vm1, %v8325_v16  ;;  %v7552_v34 = vsel %vm3653_vm10, %v7541_v30, %v7543_v31  ;;  %7771 = vmatprep.mubr.f32.mxu1 %v9441_v8 }
 0x390   : > { %7637 = vmatpush1.msra.mxu0 %v7546_v32  ;;  %8461 = vmatprep.subr.mxu1 %v9441_v8 }
 0x391   : > { %8334 = vmatmul.mubr.msk.f32.vlgmr.msra.gmra.mrb[14].mxu1 %vm4363_vm1, %v8331_v27  ;;  %7700 = vmatprep.mubr.f32.mxu0 %v9441_v8 }
 0x392   : > { %8462 = vmatpush3.msra.mxu1 %v7552_v34  ;;  %v7539_v35 = vpop.permute.xlu1 %7538  ;;  %8463 = vmatprep.mubr.msk.f32.mxu1 %vm8765_vm3, %v9441_v8 }
 0x393   : > { %v7550_v23 = vsel %vm3653_vm10, %v7537_v13, %v7539_v35  ;;  %8333 = vmatmul.mubr.msk.f32.vlgmr.msra.gmra.mrb[14].mxu0 %vm4363_vm1, %v8331_v27  ;;  %v7551_v36 = vsel %vm3653_vm10, %v7539_v35, %v7541_v30 }
 0x394   : > { %7778 = vmatprep.subr.mxu0 %v7551_v36  ;;  %7842 = vmatprep.mubr.f32.mxu0 %v9441_v8 }
 0x395   : > { %8464 = vmatmul.mubr.msk.f32.vlgmr.msra.gmra.mrb[24].mxu1 %vm4363_vm1, %v8331_v27  ;;  %7779 = vmatpush1.msra.mxu0 %v7550_v23 }
 0x397   : > { %8335 = vmatmul.mubr.msk.f32.vlgmr.msra.gmra.mrb[16].mxu0 %vm4363_vm1, %v8331_v27 }
 0x39f   : > { %v10019_v54 = vpop.permute.xlu0 %7931 }
 0x417   : > { %v4717_v37 = vpop.f32.mrb[16].mxu1 }
 0x418   : > { %v8425_v38 = vpop.f32.mrb[17].mxu1 }
 0x426   : > { %v5074_v39 = vpop.f32.mrb[18].mxu0 }
 0x427   : > { %v5075_v41 = vadd.f32 %v5074_v39, %v4717_v37  ;;  %v8430_v45 = vpop.f32.mrb[19].mxu0 }
 0x42c   : > { %v5468_v46 = vpop.f32.mrb[18].mxu1 }
 0x42d   : > { %v5480_v40 = vadd.f32 %v5468_v46, %v5075_v41  ;;  %v8435_v47 = vpop.f32.mrb[19].mxu1 }
 0x43a   : > { %v5871_v44 = vpop.f32.mrb[20].mxu0 }
 0x43b   : > { %v5883_v48 = vadd.f32 %v5871_v44, %v5480_v40  ;;  %v8440_v49 = vpop.f32.mrb[21].mxu0 }
 0x440   : > { %v6274_v43 = vpop.f32.mrb[20].mxu1 }
 0x441   : > { %v6286_v33 = vadd.f32 %v6274_v43, %v5883_v48  ;;  %v8445_v50 = vpop.f32.mrb[21].mxu1 }
 0x44e   : > { %v6677_v8 = vpop.f32.mrb[22].mxu0 }
 0x44f   : > { %v6689_v4 = vadd.f32 %v6677_v8, %v6286_v33  ;;  %v8450_v42 = vpop.f32.mrb[23].mxu0 }
 0x454   : > { %v7103_v51 = vpop.f32.mrb[22].mxu1 }
 0x455   : > { %v7115_v63 = vadd.f32 %v7103_v51, %v6689_v4  ;;  %v8455_v52 = vpop.f32.mrb[23].mxu1 }
 0x460   : > { %v7631_v2 = vpop.f32.mrb[12].mxu1 }
 0x461   : > { %v7934_v57 = vadd.f32 %v10019_v54, %v7631_v2  ;;  %v7633_v60 = vpop.f32.mrb[13].mxu1 }
 0x462   : > { %v7935_v0 = vadd.f32 %v10019_v54, %v7633_v60  ;;  %v7509_v1 = vpop.f32.mrb[24].mxu0 }
 0x463   : > { %v7943_v5 = vmul.f32 0.2, %v7934_v57  ;;  %v7521_v6 = vadd.f32 %v7509_v1, %v7115_v63  ;;  %v8460_v9 = vpop.f32.mrb[25].mxu0 }
 0x464   : > { %v7944_v11 = vmul.f32 0.2, %v7935_v0  ;;  %v7773_v12 = vpop.f32.mrb[14].mxu1 }
 0x465   : > { %v10023_v14 = vmax.f32 %v7934_v57, %v7943_v5  ;;  %v7938_v15 = vadd.f32 %v10019_v54, %v7773_v12  ;;  %v7775_v53 = vpop.f32.mrb[15].mxu1 }
 0x466   : > { %v10026_v56 = vmax.f32 %v7935_v0, %v7944_v11  ;;  %v7939_v58 = vadd.f32 %v10019_v54, %v7775_v53  ;;  %v7702_v55 = vpop.f32.mrb[14].mxu0 }
 0x467   : > { %v7961_v59 = vmul.f32 %v10023_v14, %v10023_v14  ;;  %v7947_v61 = vmul.f32 0.2, %v7938_v15  ;;  %v7936_v62 = vadd.f32 %v10019_v54, %v7702_v55  ;;  %v7704_v3 = vpop.f32.mrb[15].mxu0 }
 0x468   : > { %v7962_v16 = vmul.f32 %v10026_v56, %v10026_v56  ;;  %v7948_v17 = vmul.f32 0.2, %v7939_v58  ;;  %v7937_v18 = vadd.f32 %v10019_v54, %v7704_v3  ;;  %v7915_v7 = vpop.f32.mrb[24].mxu1 }
 0x469   : > { %v7970_v19 = vrot.slane %v7961_v59, 4  ;;  %v10035_v10 = vmax.f32 %v7938_v15, %v7947_v61  ;;  %v7945_v13 = vmul.f32 0.2, %v7936_v62  ;;  %v7927_v21 = vadd.f32 %v7915_v7, %v7521_v6  ;;  %v8465_v22 = vpop.f32.mrb[25].mxu1 }
 0x46a   : > { %v7976_v24 = vrot.slane %v7962_v16, 4  ;;  %v10037_v25 = vmax.f32 %v7939_v58, %v7948_v17  ;;  %v7946_v26 = vmul.f32 0.2, %v7937_v18  ;;  %v7844_v27 = vpop.f32.mrb[16].mxu0 }
 0x46b   : > { %v7971_v28 = vadd.f32 %v7970_v19, %v7961_v59  ;;  %v7965_v20 = vmul.f32 %v10035_v10, %v10035_v10  ;;  %v10041_v29 = vmax.f32 %v7936_v62, %v7945_v13  ;;  %v7942_v30 = vadd.f32 %v10019_v54, %v7927_v21  ;;  %v10044_v31 = vpop.f32.mrb[17].mxu0 }
 0x46c   : > { %v7977_v32 = vadd.f32 %v7976_v24, %v7962_v16  ;;  %v7966_v34 = vmul.f32 %v10037_v25, %v10037_v25  ;;  %v10048_v35 = vmax.f32 %v7937_v18, %v7946_v26  ;;  %v7940_v23 = vadd.f32 %v10019_v54, %v7844_v27 }
 0x46d   : > { %v7972_v36 = vrot.slane %v7971_v28, 2  ;;  %v7994_v37 = vrot.slane %v7965_v20, 4  ;;  %v7963_v38 = vmul.f32 %v10041_v29, %v10041_v29  ;;  %v7951_v39 = vmul.f32 0.2, %v7942_v30 }
 0x46e   : > { %v7978_v41 = vrot.slane %v7977_v32, 2  ;;  %v8000_v45 = vrot.slane %v7966_v34, 4  ;;  %v7964_v46 = vmul.f32 %v10048_v35, %v10048_v35  ;;  %v7949_v40 = vmul.f32 0.2, %v7940_v23 }
 0x46f   : > { %v7973_v47 = vadd.f32 %v7972_v36, %v7971_v28  ;;  %v7995_v44 = vadd.f32 %v7994_v37, %v7965_v20  ;;  %v7982_v48 = vrot.slane %v7963_v38, 4  ;;  %v10055_v49 = vmax.f32 %v7942_v30, %v7951_v39 }
 0x470   : > { %v7979_v43 = vadd.f32 %v7978_v41, %v7977_v32  ;;  %v8001_v33 = vadd.f32 %v8000_v45, %v7966_v34  ;;  %v7988_v50 = vrot.slane %v7964_v46, 4  ;;  %v10057_v8 = vmax.f32 %v7940_v23, %v7949_v40 }
 0x471   : > { %v7974_v4 = vrot.slane %v7973_v47, 1  ;;  %v7996_v42 = vrot.slane %v7995_v44, 2  ;;  %v7983_v51 = vadd.f32 %v7982_v48, %v7963_v38  ;;  %v7969_v63 = vmul.f32 %v10055_v49, %v10055_v49 }
 0x472   : > { %v7980_v52 = vrot.slane %v7979_v43, 1  ;;  %v8002_v2 = vrot.slane %v8001_v33, 2  ;;  %v7989_v57 = vadd.f32 %v7988_v50, %v7964_v46  ;;  %v7967_v60 = vmul.f32 %v10057_v8, %v10057_v8 }
 0x473   : > { %v7975_v0 = vadd.f32 %v7974_v4, %v7973_v47  ;;  %v7997_v1 = vadd.f32 %v7996_v42, %v7995_v44  ;;  %v7984_v5 = vrot.slane %v7983_v51, 2  ;;  %v8018_v6 = vsel %vm4137_vm11, %v7969_v63, 0.0 }
 0x474   : > { %v7981_v9 = vadd.f32 %v7980_v52, %v7979_v43  ;;  %v8003_v11 = vadd.f32 %v8002_v2, %v8001_v33  ;;  %v7990_v12 = vrot.slane %v7989_v57, 2  ;;  %v8019_v15 = vrot.slane %v8018_v6, 4 }
 0x475   : > { %v8025_v53 = vmul.f32 0.125, %v7975_v0  ;;  %v7998_v58 = vrot.slane %v7997_v1, 1  ;;  %v7985_v55 = vadd.f32 %v7984_v5, %v7983_v51  ;;  %v8006_v59 = vrot.slane %v7967_v60, 4 }
 0x476   : > { %v8026_v61 = vmul.f32 0.125, %v7981_v9  ;;  %v8004_v62 = vrot.slane %v8003_v11, 1  ;;  %v7991_v3 = vadd.f32 %v7990_v12, %v7989_v57  ;;  %v8020_v16 = vadd.f32 %v8019_v15, %v8018_v6 }
 0x477   : > { %v8034_v17 = vadd.f32 1e-08, %v8025_v53  ;;  %v7999_v18 = vadd.f32 %v7998_v58, %v7997_v1  ;;  %v7986_v7 = vrot.slane %v7985_v55, 1  ;;  %v8007_v19 = vadd.f32 %v8006_v59, %v7967_v60 }
 0x478   : > { %v8035_v13 = vadd.f32 1e-08, %v8026_v61  ;;  %v8005_v21 = vadd.f32 %v8004_v62, %v8003_v11  ;;  %v7992_v22 = vrot.slane %v7991_v3, 1  ;;  %v8021_v24 = vrot.slane %v8020_v16, 2 }
 0x479   : > { %8673 = vrsqrt.f32 %v8034_v17  ;;  %v8029_v26 = vmul.f32 0.125, %v7999_v18  ;;  %v7987_v27 = vadd.f32 %v7986_v7, %v7985_v55  ;;  %v8008_v28 = vrot.slane %v8007_v19, 2 }
 0x47a   : > { %8675 = vrsqrt.f32 %v8035_v13  ;;  %v8030_v20 = vmul.f32 0.125, %v8005_v21  ;;  %v7993_v30 = vadd.f32 %v7992_v22, %v7991_v3  ;;  %v8022_v32 = vadd.f32 %v8021_v24, %v8020_v16 }
 0x47b   : > { %v8038_v34 = vadd.f32 1e-08, %v8029_v26  ;;  %v8027_v23 = vmul.f32 0.125, %v7987_v27  ;;  %v8009_v36 = vadd.f32 %v8008_v28, %v8007_v19  ;;  %v7941_v37 = vadd.f32 %v10019_v54, %v10044_v31 }
 0x47c   : > { %v8039_v38 = vadd.f32 1e-08, %v8030_v20  ;;  %v8028_v39 = vmul.f32 0.125, %v7993_v30  ;;  %v8023_v41 = vrot.slane %v8022_v32, 1 }
 0x47d   : > { %8677 = vrsqrt.f32 %v8038_v34  ;;  %v8036_v45 = vadd.f32 1e-08, %v8027_v23  ;;  %v8010_v46 = vrot.slane %v8009_v36, 1  ;;  %v7950_v40 = vmul.f32 0.2, %v7941_v37 }
 0x47e   : > { %8679 = vrsqrt.f32 %v8039_v38  ;;  %v8037_v47 = vadd.f32 1e-08, %v8028_v39  ;;  %v8024_v44 = vadd.f32 %v8023_v41, %v8022_v32 }
 0x47f   : > { %8681 = vrsqrt.f32 %v8036_v45  ;;  %v8011_v48 = vadd.f32 %v8010_v46, %v8009_v36  ;;  %v7959_v43 = vmax.f32 %v7941_v37, %v7950_v40 }
 0x480   : > { %8683 = vrsqrt.f32 %v8037_v47  ;;  %v8033_v33 = vmul.f32 0.125, %v8024_v44 }
 0x481   : > { %v8031_v50 = vmul.f32 0.125, %v8011_v48  ;;  %v7968_v54 = vmul.f32 %v7959_v43, %v7959_v43 }
 0x482   : > { %v8042_v31 = vadd.f32 1e-08, %v8033_v33 }
 0x483   : > { %v8674_v4 = vpop.eup %8673  ;;  %v8040_v42 = vadd.f32 1e-08, %v8031_v50  ;;  %v8012_v51 = vrot.slane %v7968_v54, 4 }
 0x484   : > { %v8676_v63 = vpop.eup %8675  ;;  %v8052_v52 = vmul.f32 %v8674_v4, %v10023_v14  ;;  %8685 = vrsqrt.f32 %v8042_v31 }
 0x485   : > { %v8053_v2 = vmul.f32 %v8676_v63, %v10026_v56  ;;  %8687 = vrsqrt.f32 %v8040_v42  ;;  %v8013_v57 = vadd.f32 %v8012_v51, %v7968_v54 }
 0x486   : > { %8061 = vst [vmem:[%s10071_s29] sm:$0xff] %v8052_v52 }
 0x487   : > { %v8678_v60 = vpop.eup %8677  ;;  %8062 = vst [vmem:[%s10071_s29 + $0x8] sm:$0xff] %v8053_v2  ;;  %v8014_v0 = vrot.slane %v8013_v57, 2 }
 0x488   : > { %v8680_v1 = vpop.eup %8679  ;;  %v8056_v14 = vmul.f32 %v8678_v60, %v10035_v10 }
 0x489   : > { %v8682_v5 = vpop.eup %8681  ;;  %v8057_v56 = vmul.f32 %v8680_v1, %v10037_v25  ;;  %v8015_v6 = vadd.f32 %v8014_v0, %v8013_v57 }
 0x48a   : > { %v8684_v9 = vpop.eup %8683  ;;  %8065 = vst [vmem:[%s10071_s29 + $0x20] sm:$0xff] %v8056_v14  ;;  %v8054_v11 = vmul.f32 %v8682_v5, %v10041_v29 }
 0x48b   : > { %8066 = vst [vmem:[%s10071_s29 + $0x28] sm:$0xff] %v8057_v56  ;;  %v8055_v12 = vmul.f32 %v8684_v9, %v10048_v35  ;;  %v8016_v15 = vrot.slane %v8015_v6, 1 }
 0x48c   : > { %8063 = vst [vmem:[%s10071_s29 + $0x10] sm:$0xff] %v8054_v11 }
 0x48d   : > { %8064 = vst [vmem:[%s10071_s29 + $0x18] sm:$0xff] %v8055_v12  ;;  %v8017_v53 = vadd.f32 %v8016_v15, %v8015_v6 }
 0x48e   : > { %v8686_v10 = vpop.eup %8685 }
 0x48f   : > { %v8688_v25 = vpop.eup %8687  ;;  %v8060_v58 = vmul.f32 %v8686_v10, %v10055_v49  ;;  %v8032_v55 = vmul.f32 0.125, %v8017_v53 }
 0x490   : > { %v8058_v59 = vmul.f32 %v8688_v25, %v10057_v8 }
 0x491   : > { %8069 = vst.msk [vmem:[%s10071_s29 + $0x40] sm:$0xff] %vm4137_vm11, %v8060_v58  ;;  %v8041_v29 = vadd.f32 1e-08, %v8032_v55 }
 0x492   : > { %8067 = vst [vmem:[%s10071_s29 + $0x30] sm:$0xff] %v8058_v59 }
 0x493   : > { %8689 = vrsqrt.f32 %v8041_v29 }
 0x49d   : > { %v8690_v35 = vpop.eup %8689 }
 0x49e   : > { %v8059_v61 = vmul.f32 %v8690_v35, %v7959_v43 }
 0x4a0   : > { %8068 = vst [vmem:[%s10071_s29 + $0x38] sm:$0xff] %v8059_v61 }
 0x4a1   : > { %8705 = shalt.err (!%p8702_p3)
}
 0x4a2   : > { %s8706_s16 = scalar_lea.hbm %s10093_s28, 1152  ;;  %s8710_s19 = scalar_lea.hbm %s10144_s6, 2304 }
 0x4a3   : > { %p8707_p4 = scmp.ne.s32.totalorder %s10093_s28, %s8706_s16  ;;  %p8711_p9 = scmp.lt.u32.totalorder %s10093_s28, %s10144_s6 }
 0x4a4   : > { %p8712_p10 = scmp.lt.u32.totalorder %s8710_s19, %s8706_s16  ;;  %p8714_p12 = scmp.lt.u32.totalorder %s8706_s16, %s10093_s28 }
 0x4a5   : > { %p8708_p7 = pnand %p8707_p4, %p8842_p5 }
 0x4a6   : > { %p8713_p11 = por %p8712_p10, %p8711_p9 }
 0x4a7   : > { %p8709_p8 = pneg %p8708_p7 }
 0x4a8   : > { %p8715_p13 = por %p8714_p12, %p8713_p11 }
 0x4aa   : > { %p8716_p0 = pnand %p8715_p13, %p8709_p8 }
 0x4ac   : > { %8719 = shalt.err (!%p8716_p0)
}
 0x4ad   : > { %8597 = dma.vmem_to_hbm [thread:$0]  (%p8842_p5), %s10095_s12, 1152, %s10093_s28, %s8071_s9  }
 0x4ae PF: > { %p8603_p1 = scmp.ge.s32.totalorder %s8754_s24, 2  ;;  %s8097_s11 = sand.u32 1, %s8742_s21  }
 0x4af   : > { %s8098_s13 = scalar_lea.sflag [#allocation4], %s8097_s11 }
 0x4b0   : > { %p8600_p2 = pnand %p8603_p1, %p8846_p6 }
 0x4b2   : > { %8737 = dma.done.wait (!%p8600_p2), %s8098_s13, 1152  }
 0x4b3   : > { %8739 = vsyncadd (!%p8600_p2), %s8098_s13, 4294966144  ;;  %p16_p3 = scmp.ge.s32.totalorder %s8829_s27, 4   ;;  %s10147_s21 = smov %s8746_s22 }
 0x4b4   : > { %s10148_s22 = smov %s8750_s23  ;;  %s10149_s23 = smov %s8840_s30 }
 0x4b5   : > { %s10150_s24 = smov %s8829_s27  ;;  %18 = sbr.rel (!%p16_p3) target bundleno = 3 (0x3), region = 95 }
 0x4bc   :  { %8103 = vsyncpa [#allocation4], 1 }
 0x4bd   :  { %8105 = vsyncpa [#allocation4 + $0x1], 1 }

</bundles_post_ra>
